<compile_context>
chip_gen: v7x
topology: tpu7x:2x2x1
jax: 0.10.0
libtpu: 0.0.40
codegen_flags: <defaults>
</compile_context>

<pallas_src>
import functools

import jax
import jax.numpy as jnp
from jax import lax
from jax.experimental import pallas as pl
from jax.experimental.pallas import tpu as pltpu


def _rep_spec(shape):
    """Full-array BlockSpec revisited (fetched once) on every grid step."""
    zeros = (0,) * len(shape)
    return pl.BlockSpec(shape, lambda i, _z=zeros: _z)


def _pad(n, m):
    return -(-n // m) * m


def _vmem_estimate(tb, L, P, E):
    """Lane-padding-aware VMEM estimate (bytes) for one grid step."""
    PE = P * E
    lpe = _pad(PE, 128)          # packed lane width, padded
    lp = 128                     # any narrow (<=128) last dim pads to 128 lanes
    b = 0
    b += 2 * L * tb * lpe * 2            # xh tiles (bf16, double buffered)
    b += 2 * L * tb * lp * 4             # mask tiles (f32, lane padded, double buffered)
    b += 2 * tb * lp * 4                 # output slab (double buffered)
    b += L * tb * lpe * 2                # h_scratch (bf16)
    b += L * tb * lp * 4                 # node scores / weights temp (f32)
    b += 2 * L * tb * lpe * 4            # expanded weights + product temporaries (f32)
    b += 2 * (lpe * lpe * 2 + lpe * lp * 2 + 8 * lp * 4)   # weights
    return b


def _pick_tb(B, L, P, E, cap_bytes=40 << 20, max_tb=512):
    """Largest 8-aligned divisor of B that keeps grid>=2 under the VMEM cap."""
    cands = [t for t in range(8, min(B, max_tb) + 1, 8) if B % t == 0]
    good = [t for t in cands if B // t >= 2 and _vmem_estimate(t, L, P, E) <= cap_bytes]
    if good:
        return max(good)
    ok = [t for t in cands if _vmem_estimate(t, L, P, E) <= cap_bytes]
    if ok:
        return max(ok)
    return cands[0] if cands else B      # tiny / odd B: single full-batch tile


def meta_des_kernel(L, P, E,
                    xh_ref,      # (L, Tb, PE)  bf16  gathered+projected RNN inputs (path-packed lanes)
                    mask_ref,    # (L, Tb, P)   f32   validity mask
                    w_hh_ref,    # (PE, PE)     bf16  block-diagonal recurrent weight
                    w_cols_ref,  # (PE, 2P+3)   bf16  [w_node_bd | w_path_bd | fused head]
                    b_head_ref,  # (1, 3)       f32   fused head bias
                    out_ref,     # (Tb, 4+P+L*P) f32  consolidated output slab
                    h_scratch):  # VMEM (L, Tb, PE) bf16
    tb = out_ref.shape[0]
    PE = P * E

    # ---- Serial RNN recurrence: h_t = tanh(xh_t + h_{t-1} @ W_hh_bd). -------
    w_hh = w_hh_ref[...]                                        # (PE, PE) bf16

    h0 = jnp.tanh(xh_ref[0].astype(jnp.float32))                # h_{-1}=0: skip the first matmul
    h_scratch[0] = h0.astype(jnp.bfloat16)

    def step(t, h):
        acc = jnp.dot(h.astype(jnp.bfloat16), w_hh,
                      preferred_element_type=jnp.float32)       # (Tb, PE)
        h_new = jnp.tanh(xh_ref[t].astype(jnp.float32) + acc)
        h_scratch[t] = h_new.astype(jnp.bfloat16)
        return h_new

    lax.fori_loop(1, L, step, h0, unroll=True)

    # ---- Node-attention scores: ONE batched block-diagonal matmul. ----------
    w_cols = w_cols_ref[...]                                    # (PE, 2P+3) bf16
    h_all = h_scratch[...].reshape(L * tb, PE)                  # bf16
    scores = jnp.dot(h_all, w_cols[:, 0:P],
                     preferred_element_type=jnp.float32)        # (L*Tb, P)
    scores = scores.reshape(L, tb, P)

    # Masked softmax over time: reductions over the leading dim are pure
    # elementwise ops over L (Tb, P) tiles (no cross-lane work).
    # Assumes every (batch, path) group has length >= 1 (pack_padded_sequence
    # requires this too); a fully-masked group would degenerate to uniform.
    mask = mask_ref[...]                                        # (L, Tb, P)
    s = jnp.where(mask == 0.0, jnp.float32(-1e9), scores)
    smax = jnp.max(s, axis=0, keepdims=True)
    e = jnp.exp(s - smax)
    denom = jnp.sum(e, axis=0, keepdims=True)
    node_w = e / denom                                          # (L, Tb, P) f32

    # ---- Expand per-path weights onto their E lanes via a tiny MXU matmul. --
    lane = lax.broadcasted_iota(jnp.int32, (P, PE), 1)
    row = lax.broadcasted_iota(jnp.int32, (P, PE), 0)
    expand = ((lane >= row * E) & (lane < (row + 1) * E)).astype(jnp.bfloat16)  # (P, PE)

    nw_exp = jnp.dot(node_w.reshape(L * tb, P).astype(jnp.bfloat16), expand,
                     preferred_element_type=jnp.float32)        # (L*Tb, PE)
    nw_exp = nw_exp.reshape(L, tb, PE)

    # Weighted node sum -> per-path embedding (still lane packed): L full-vreg
    # multiply-adds, no width-1 lane broadcasts.
    path_emb = jnp.sum(nw_exp * h_scratch[...].astype(jnp.float32), axis=0)   # (Tb, PE)

    # ---- Path attention: softmax over the P lane blocks. --------------------
    pw = jnp.dot(path_emb.astype(jnp.bfloat16), w_cols[:, P:2 * P],
                 preferred_element_type=jnp.float32)            # (Tb, P)
    pw = pw - jnp.max(pw, axis=1, keepdims=True)
    pe_exp = jnp.exp(pw)
    path_w = pe_exp / jnp.sum(pe_exp, axis=1, keepdims=True)    # (Tb, P)

    pw_exp = jnp.dot(path_w.astype(jnp.bfloat16), expand,
                     preferred_element_type=jnp.float32)        # (Tb, PE)
    pew = (path_emb * pw_exp).astype(jnp.bfloat16)              # path-weighted, packed

    # ---- Fused prediction head: one (Tb, PE) @ (PE, 3) push. ----------------
    head = jnp.dot(pew, w_cols[:, 2 * P:2 * P + 3],
                   preferred_element_type=jnp.float32) + b_head_ref[...]      # (Tb, 3)
    output = head[:, 0:1]                                       # hidden@w_out + b_out
    out_new = head[:, 1:3]                                      # hidden@wn_h + output*wn_o + b_new
    out_new = out_new - jnp.max(out_new, axis=1, keepdims=True)
    e_n = jnp.exp(out_new)
    softmax = e_n / jnp.sum(e_n, axis=1, keepdims=True)

    # ---- Single consolidated output slab (one writeback DMA per step). ------
    out_ref[:, 0:1] = output
    out_ref[:, 1:2] = jax.nn.sigmoid(output)
    out_ref[:, 2:4] = softmax
    out_ref[:, 4:4 + P] = path_w
    for t in range(L):                                          # static lane-offset stores
        out_ref[:, 4 + P + t * P:4 + P + (t + 1) * P] = node_w[t]


def init_params(key, first_dim, emb_dim):
    ks = jax.random.split(key, 16)

    def w(k, shape, scale=0.1):
        return scale * jax.random.normal(k, shape, jnp.float32)

    return dict(
        w_lin=w(ks[0], (first_dim, emb_dim)), b_lin=w(ks[1], (1, emb_dim)),
        w_ih=w(ks[2], (emb_dim, emb_dim)),    b_ih=w(ks[3], (1, emb_dim)),
        w_hh=w(ks[4], (emb_dim, emb_dim)),    b_hh=w(ks[5], (1, emb_dim)),
        w_node=w(ks[6], (emb_dim, 1)),
        w_path=w(ks[7], (emb_dim, 1)),
        w_hid=w(ks[8], (emb_dim, emb_dim)),   b_hid=w(ks[9], (1, emb_dim)),
        w_out=w(ks[10], (emb_dim, 1)),        b_out=w(ks[11], (1, 1)),
        wn_h=w(ks[12], (emb_dim, 2)),         wn_o=w(ks[13], (1, 2)),
        b_new=w(ks[14], (1, 2)),
    )


def meta_des_forward(path_feature, lengths, mask, ppi_emd, params, *, tb=None,
                     interpret=False):
    # `lengths` kept for interface parity; `mask` already encodes (t < length).
    del lengths
    B, P, L = path_feature.shape
    E = params["w_lin"].shape[1]
    PE = P * E

    f32 = lambda a: jnp.asarray(a, jnp.float32)
    w_lin, b_lin = f32(params["w_lin"]), f32(params["b_lin"])
    w_ih, b_ih = f32(params["w_ih"]), f32(params["b_ih"])
    w_hh, b_hh = f32(params["w_hh"]), f32(params["b_hh"])
    w_node, w_path = f32(params["w_node"]), f32(params["w_path"])
    w_hid, b_hid = f32(params["w_hid"]), f32(params["b_hid"])
    w_out, b_out = f32(params["w_out"]), f32(params["b_out"])
    wn_h, wn_o, b_new = f32(params["wn_h"]), f32(params["wn_o"]), f32(params["b_new"])

    # ---- Fold Linear + RNN input projection into the embedding table, then
    #      gather straight into the kernel's packed (L, B, P*E) layout. -------
    w_comb = w_lin @ w_ih                                       # (F, E)
    b_comb = b_lin @ w_ih + b_ih + b_hh                         # (1, E)
    table = (f32(ppi_emd) @ w_comb + b_comb).astype(jnp.bfloat16)   # (num_nodes, E)
    idx = jnp.transpose(path_feature.astype(jnp.int32), (2, 0, 1))  # (L, B, P)
    xh = table[idx].reshape(L, B, PE)                           # (L, B, P*E) bf16

    mask_lbp = jnp.transpose(f32(mask), (2, 0, 1))              # (L, B, P)

    # ---- Block-diagonal / stacked weights for the lane-packed layout. -------
    eye_p = jnp.eye(P, dtype=jnp.float32)
    w_hh_bd = jnp.einsum("pq,ij->piqj", eye_p, w_hh).reshape(PE, PE).astype(jnp.bfloat16)
    w_node_bd = jnp.einsum("pq,io->piq", eye_p, w_node).reshape(PE, P)
    w_path_bd = jnp.einsum("pq,io->piq", eye_p, w_path).reshape(PE, P)

    # Fused head: hidden_linear -> (output_linear, output_linear_new, wn_o).
    # out_new = hidden@(wn_h + w_out@wn_o) + b_new + (b_hid@w_out + b_out)*wn_o
    w_hid_stack = jnp.tile(w_hid, (P, 1))                       # (PE, E)
    wno = wn_h + w_out @ wn_o                                   # (E, 2)
    w_head = jnp.concatenate([w_hid_stack @ w_out, w_hid_stack @ wno], axis=1)   # (PE, 3)
    b_head = jnp.concatenate([b_hid @ w_out + b_out,
                              b_hid @ wno + b_new + (b_hid @ w_out + b_out) * wn_o
                              - (b_hid @ w_out) * wn_o],        # == b_hid@wno + b_new + b_out*wn_o
                             axis=1)                            # (1, 3)
    w_cols = jnp.concatenate([w_node_bd, w_path_bd, w_head],
                             axis=1).astype(jnp.bfloat16)       # (PE, 2P+3)

    # ---- Tiling --------------------------------------------------------------
    if tb is None:
        tb = _pick_tb(B, L, P, E)
    assert B % tb == 0 and (tb % 8 == 0 or tb == B), "tb must divide B and be 8-aligned (or == B)"
    grid = (B // tb,)
    n_out = 4 + P + L * P

    vmem_limit = int(min(max(int(1.25 * _vmem_estimate(tb, L, P, E)) + (2 << 20),
                             8 << 20), 48 << 20))

    kernel = functools.partial(meta_des_kernel, L, P, E)
    slab = pl.pallas_call(
        kernel,
        out_shape=jax.ShapeDtypeStruct((B, n_out), jnp.float32),
        grid_spec=pltpu.PrefetchScalarGridSpec(
            num_scalar_prefetch=0,
            grid=grid,
            in_specs=[
                pl.BlockSpec((L, tb, PE), lambda i: (0, i, 0)),   # xh tile
                pl.BlockSpec((L, tb, P), lambda i: (0, i, 0)),    # mask tile
                _rep_spec((PE, PE)),                              # W_hh block-diag
                _rep_spec((PE, 2 * P + 3)),                       # merged attention/head weights
                _rep_spec((1, 3)),                                # head bias
            ],
            out_specs=pl.BlockSpec((tb, n_out), lambda i: (i, 0)),
            scratch_shapes=[pltpu.VMEM((L, tb, PE), jnp.bfloat16)],
        ),
        compiler_params=pltpu.CompilerParams(
            dimension_semantics=("parallel",),   # independent batch tiles -> 2 TCs on v7x
            vmem_limit_bytes=vmem_limit,
        ),
        interpret=interpret,
    )(xh, mask_lbp, w_hh_bd, w_cols, b_head)

    output = slab[:, 0:1]
    out_sig = slab[:, 1:2]
    out_sm = slab[:, 2:4]
    path_w = slab[:, 4:4 + P]
    node_w = slab[:, 4 + P:].reshape(B, L, P).transpose(0, 2, 1)  # (B, P, L)
    return output, out_sig, out_sm, node_w, path_w


def reference_forward(path_feature, mask, ppi_emd, params):
    """Pure-JAX f32 reference of the PyTorch module (full-length RNN + mask)."""
    B, P, L = path_feature.shape
    E = params["w_lin"].shape[1]
    N = B * P
    feat = ppi_emd[path_feature.reshape(N, L)]                  # (N, L, F)
    x = feat @ params["w_lin"] + params["b_lin"]                # (N, L, E)
    xs = jnp.transpose(x, (1, 0, 2))                            # (L, N, E)

    def step(h, x_t):
        h = jnp.tanh(x_t @ params["w_ih"] + params["b_ih"]
                     + h @ params["w_hh"] + params["b_hh"])
        return h, h

    _, hs = lax.scan(step, jnp.zeros((N, E), jnp.float32), xs)
    rnn_out = jnp.transpose(hs, (1, 0, 2))                      # (N, L, E)

    w = (rnn_out @ params["w_node"])[..., 0]                    # (N, L)
    w = jnp.where(mask.reshape(N, L) == 0.0, -1e9, w)
    node_w = jax.nn.softmax(w, axis=1)
    path_emb = jnp.sum(rnn_out * node_w[..., None], axis=1).reshape(B, P, E)

    pw = (path_emb @ params["w_path"])[..., 0]                  # (B, P)
    path_w = jax.nn.softmax(pw, axis=1)
    out_emb = jnp.sum(path_emb * path_w[..., None], axis=1)     # (B, E)

    hidden = out_emb @ params["w_hid"] + params["b_hid"]
    output = hidden @ params["w_out"] + params["b_out"]
    out_new = hidden @ params["wn_h"] + output * params["wn_o"] + params["b_new"]
    return (output, jax.nn.sigmoid(output), jax.nn.softmax(out_new, axis=1),
            node_w.reshape(B, P, L), path_w)


if __name__ == "__main__":
    # Small shapes consistent with the module: P*E = 128 packs exactly one vreg
    # of lanes; B chosen so the batch-tile grid has >= 2 steps.
    B, P, L = 32, 4, 8            # batch, path_num, path_len
    FIRST_DIM, EMB_DIM = 16, 32
    NUM_NODES = 24

    key = jax.random.PRNGKey(0)
    k1, k2, k3 = jax.random.split(key, 3)

    path_feature = jax.random.randint(k1, (B, P, L), 0, NUM_NODES)     # node ids
    lengths = jax.random.randint(k2, (B, P), 1, L + 1)                 # >= 1
    t_idx = jnp.arange(L)[None, None, :]
    mask = (t_idx < lengths[:, :, None]).astype(jnp.float32)           # (B, P, L)
    ppi_emd = jax.random.normal(k3, (NUM_NODES, FIRST_DIM), jnp.float32)

    params = init_params(jax.random.PRNGKey(42), FIRST_DIM, EMB_DIM)

    outs = meta_des_forward(path_feature, lengths, mask, ppi_emd, params)
    jax.block_until_ready(outs)

    refs = reference_forward(path_feature, mask, ppi_emd, params)
    names = ("output", "sigmoid", "softmax", "node_weights", "path_weights")
    for name, got, want in zip(names, outs, refs):
        assert got.shape == want.shape, (name, got.shape, want.shape)
        err = float(jnp.max(jnp.abs(got - want)))
        # loose tolerance: kernel feeds the MXU in bf16 (f32 accumulation)
        assert err < 5e-2, (name, err)

    print("KERNEL_OK")
</pallas_src>

<mosaic_0001>
module attributes {stable_mosaic.version = 11 : i64} {
  func.func @meta_des_kernel(%arg0: i32, %arg1: memref<8x16x128xbf16, #tpu.memory_space<vmem>>, %arg2: memref<8x16x4xf32, #tpu.memory_space<vmem>>, %arg3: memref<128x128xbf16, #tpu.memory_space<vmem>>, %arg4: memref<128x11xbf16, #tpu.memory_space<vmem>>, %arg5: memref<1x3xf32, #tpu.memory_space<vmem>>, %arg6: memref<16x40xf32, #tpu.memory_space<vmem>>, %arg7: memref<8x16x128xbf16, #tpu.memory_space<vmem>>) attributes {dimension_semantics = [#tpu.dimension_semantics<parallel>], iteration_bounds = array<i64: 2>, scalar_prefetch = 0 : i64, scratch_operands = 1 : i64, tpu.core_type = #tpu.core_type<tc>, window_params = [{transform_indices = @transform_0, window_bounds = array<i64: 8, 16, 128>}, {transform_indices = @transform_1, window_bounds = array<i64: 8, 16, 4>}, {pipeline_mode = #tpu.pipeline_mode<synchronous>, transform_indices = @transform_2, window_bounds = array<i64: 128, 128>}, {pipeline_mode = #tpu.pipeline_mode<synchronous>, transform_indices = @transform_3, window_bounds = array<i64: 128, 11>}, {pipeline_mode = #tpu.pipeline_mode<synchronous>, transform_indices = @transform_4, window_bounds = array<i64: 1, 3>}, {transform_indices = @transform_5, window_bounds = array<i64: 16, 40>}]} {
    %c0 = arith.constant 0 : index
    %c0_0 = arith.constant 0 : index
    %0 = vector.load %arg3[%c0, %c0_0] : memref<128x128xbf16, #tpu.memory_space<vmem>>, vector<128x128xbf16>
    %c0_1 = arith.constant 0 : index
    %c0_2 = arith.constant 0 : index
    %c0_3 = arith.constant 0 : index
    %1 = vector.load %arg1[%c0_1, %c0_2, %c0_3] : memref<8x16x128xbf16, #tpu.memory_space<vmem>>, vector<1x16x128xbf16>
    %2 = vector.shape_cast %1 : vector<1x16x128xbf16> to vector<16x128xbf16>
    %3 = arith.extf %2 : vector<16x128xbf16> to vector<16x128xf32>
    %4 = math.tanh %3 : vector<16x128xf32>
    %5 = arith.truncf %4 : vector<16x128xf32> to vector<16x128xbf16>
    %c0_4 = arith.constant 0 : index
    %c0_5 = arith.constant 0 : index
    %c0_6 = arith.constant 0 : index
    %6 = vector.load %arg7[%c0_4, %c0_5, %c0_6] : memref<8x16x128xbf16, #tpu.memory_space<vmem>>, vector<1x16x128xbf16>
    %7 = vector.shape_cast %6 : vector<1x16x128xbf16> to vector<16x128xbf16>
    %8 = vector.shape_cast %5 : vector<16x128xbf16> to vector<1x16x128xbf16>
    tpu.vector_store %arg7[%c0_4, %c0_5, %c0_6], %8 {strides = array<i32>} : memref<8x16x128xbf16, #tpu.memory_space<vmem>>, vector<1x16x128xbf16>,
    %c1_i32 = arith.constant 1 : i32
    %9 = arith.truncf %4 : vector<16x128xf32> to vector<16x128xbf16>
    %cst = arith.constant dense<0.000000e+00> : vector<16x128xf32>
    %10 = tpu.matmul %9, %0, %cst {dimension_numbers = #tpu.dot_dimension_numbers<[1], [0], [0], [1], [0, 0, 1, 1], [], []>} : vector<16x128xbf16>, vector<128x128xbf16>, vector<16x128xf32> -> vector<16x128xf32>
    %11 = arith.index_cast %c1_i32 : i32 to index
    %c0_7 = arith.constant 0 : index
    %c0_8 = arith.constant 0 : index
    %12 = vector.load %arg1[%11, %c0_7, %c0_8] : memref<8x16x128xbf16, #tpu.memory_space<vmem>>, vector<1x16x128xbf16>
    %13 = vector.shape_cast %12 : vector<1x16x128xbf16> to vector<16x128xbf16>
    %14 = arith.extf %13 : vector<16x128xbf16> to vector<16x128xf32>
    %15 = arith.addf %14, %10 : vector<16x128xf32>
    %16 = math.tanh %15 : vector<16x128xf32>
    %17 = arith.truncf %16 : vector<16x128xf32> to vector<16x128xbf16>
    %18 = arith.index_cast %c1_i32 : i32 to index
    %c0_9 = arith.constant 0 : index
    %c0_10 = arith.constant 0 : index
    %19 = vector.load %arg7[%18, %c0_9, %c0_10] : memref<8x16x128xbf16, #tpu.memory_space<vmem>>, vector<1x16x128xbf16>
    %20 = vector.shape_cast %19 : vector<1x16x128xbf16> to vector<16x128xbf16>
    %21 = vector.shape_cast %17 : vector<16x128xbf16> to vector<1x16x128xbf16>
    tpu.vector_store %arg7[%18, %c0_9, %c0_10], %21 {strides = array<i32>} : memref<8x16x128xbf16, #tpu.memory_space<vmem>>, vector<1x16x128xbf16>,
    %c2_i32 = arith.constant 2 : i32
    %22 = arith.truncf %16 : vector<16x128xf32> to vector<16x128xbf16>
    %cst_11 = arith.constant dense<0.000000e+00> : vector<16x128xf32>
    %23 = tpu.matmul %22, %0, %cst_11 {dimension_numbers = #tpu.dot_dimension_numbers<[1], [0], [0], [1], [0, 0, 1, 1], [], []>} : vector<16x128xbf16>, vector<128x128xbf16>, vector<16x128xf32> -> vector<16x128xf32>
    %24 = arith.index_cast %c2_i32 : i32 to index
    %c0_12 = arith.constant 0 : index
    %c0_13 = arith.constant 0 : index
    %25 = vector.load %arg1[%24, %c0_12, %c0_13] : memref<8x16x128xbf16, #tpu.memory_space<vmem>>, vector<1x16x128xbf16>
    %26 = vector.shape_cast %25 : vector<1x16x128xbf16> to vector<16x128xbf16>
    %27 = arith.extf %26 : vector<16x128xbf16> to vector<16x128xf32>
    %28 = arith.addf %27, %23 : vector<16x128xf32>
    %29 = math.tanh %28 : vector<16x128xf32>
    %30 = arith.truncf %29 : vector<16x128xf32> to vector<16x128xbf16>
    %31 = arith.index_cast %c2_i32 : i32 to index
    %c0_14 = arith.constant 0 : index
    %c0_15 = arith.constant 0 : index
    %32 = vector.load %arg7[%31, %c0_14, %c0_15] : memref<8x16x128xbf16, #tpu.memory_space<vmem>>, vector<1x16x128xbf16>
    %33 = vector.shape_cast %32 : vector<1x16x128xbf16> to vector<16x128xbf16>
    %34 = vector.shape_cast %30 : vector<16x128xbf16> to vector<1x16x128xbf16>
    tpu.vector_store %arg7[%31, %c0_14, %c0_15], %34 {strides = array<i32>} : memref<8x16x128xbf16, #tpu.memory_space<vmem>>, vector<1x16x128xbf16>,
    %c3_i32 = arith.constant 3 : i32
    %35 = arith.truncf %29 : vector<16x128xf32> to vector<16x128xbf16>
    %cst_16 = arith.constant dense<0.000000e+00> : vector<16x128xf32>
    %36 = tpu.matmul %35, %0, %cst_16 {dimension_numbers = #tpu.dot_dimension_numbers<[1], [0], [0], [1], [0, 0, 1, 1], [], []>} : vector<16x128xbf16>, vector<128x128xbf16>, vector<16x128xf32> -> vector<16x128xf32>
    %37 = arith.index_cast %c3_i32 : i32 to index
    %c0_17 = arith.constant 0 : index
    %c0_18 = arith.constant 0 : index
    %38 = vector.load %arg1[%37, %c0_17, %c0_18] : memref<8x16x128xbf16, #tpu.memory_space<vmem>>, vector<1x16x128xbf16>
    %39 = vector.shape_cast %38 : vector<1x16x128xbf16> to vector<16x128xbf16>
    %40 = arith.extf %39 : vector<16x128xbf16> to vector<16x128xf32>
    %41 = arith.addf %40, %36 : vector<16x128xf32>
    %42 = math.tanh %41 : vector<16x128xf32>
    %43 = arith.truncf %42 : vector<16x128xf32> to vector<16x128xbf16>
    %44 = arith.index_cast %c3_i32 : i32 to index
    %c0_19 = arith.constant 0 : index
    %c0_20 = arith.constant 0 : index
    %45 = vector.load %arg7[%44, %c0_19, %c0_20] : memref<8x16x128xbf16, #tpu.memory_space<vmem>>, vector<1x16x128xbf16>
    %46 = vector.shape_cast %45 : vector<1x16x128xbf16> to vector<16x128xbf16>
    %47 = vector.shape_cast %43 : vector<16x128xbf16> to vector<1x16x128xbf16>
    tpu.vector_store %arg7[%44, %c0_19, %c0_20], %47 {strides = array<i32>} : memref<8x16x128xbf16, #tpu.memory_space<vmem>>, vector<1x16x128xbf16>,
    %c4_i32 = arith.constant 4 : i32
    %48 = arith.truncf %42 : vector<16x128xf32> to vector<16x128xbf16>
    %cst_21 = arith.constant dense<0.000000e+00> : vector<16x128xf32>
    %49 = tpu.matmul %48, %0, %cst_21 {dimension_numbers = #tpu.dot_dimension_numbers<[1], [0], [0], [1], [0, 0, 1, 1], [], []>} : vector<16x128xbf16>, vector<128x128xbf16>, vector<16x128xf32> -> vector<16x128xf32>
    %50 = arith.index_cast %c4_i32 : i32 to index
    %c0_22 = arith.constant 0 : index
    %c0_23 = arith.constant 0 : index
    %51 = vector.load %arg1[%50, %c0_22, %c0_23] : memref<8x16x128xbf16, #tpu.memory_space<vmem>>, vector<1x16x128xbf16>
    %52 = vector.shape_cast %51 : vector<1x16x128xbf16> to vector<16x128xbf16>
    %53 = arith.extf %52 : vector<16x128xbf16> to vector<16x128xf32>
    %54 = arith.addf %53, %49 : vector<16x128xf32>
    %55 = math.tanh %54 : vector<16x128xf32>
    %56 = arith.truncf %55 : vector<16x128xf32> to vector<16x128xbf16>
    %57 = arith.index_cast %c4_i32 : i32 to index
    %c0_24 = arith.constant 0 : index
    %c0_25 = arith.constant 0 : index
    %58 = vector.load %arg7[%57, %c0_24, %c0_25] : memref<8x16x128xbf16, #tpu.memory_space<vmem>>, vector<1x16x128xbf16>
    %59 = vector.shape_cast %58 : vector<1x16x128xbf16> to vector<16x128xbf16>
    %60 = vector.shape_cast %56 : vector<16x128xbf16> to vector<1x16x128xbf16>
    tpu.vector_store %arg7[%57, %c0_24, %c0_25], %60 {strides = array<i32>} : memref<8x16x128xbf16, #tpu.memory_space<vmem>>, vector<1x16x128xbf16>,
    %c5_i32 = arith.constant 5 : i32
    %61 = arith.truncf %55 : vector<16x128xf32> to vector<16x128xbf16>
    %cst_26 = arith.constant dense<0.000000e+00> : vector<16x128xf32>
    %62 = tpu.matmul %61, %0, %cst_26 {dimension_numbers = #tpu.dot_dimension_numbers<[1], [0], [0], [1], [0, 0, 1, 1], [], []>} : vector<16x128xbf16>, vector<128x128xbf16>, vector<16x128xf32> -> vector<16x128xf32>
    %63 = arith.index_cast %c5_i32 : i32 to index
    %c0_27 = arith.constant 0 : index
    %c0_28 = arith.constant 0 : index
    %64 = vector.load %arg1[%63, %c0_27, %c0_28] : memref<8x16x128xbf16, #tpu.memory_space<vmem>>, vector<1x16x128xbf16>
    %65 = vector.shape_cast %64 : vector<1x16x128xbf16> to vector<16x128xbf16>
    %66 = arith.extf %65 : vector<16x128xbf16> to vector<16x128xf32>
    %67 = arith.addf %66, %62 : vector<16x128xf32>
    %68 = math.tanh %67 : vector<16x128xf32>
    %69 = arith.truncf %68 : vector<16x128xf32> to vector<16x128xbf16>
    %70 = arith.index_cast %c5_i32 : i32 to index
    %c0_29 = arith.constant 0 : index
    %c0_30 = arith.constant 0 : index
    %71 = vector.load %arg7[%70, %c0_29, %c0_30] : memref<8x16x128xbf16, #tpu.memory_space<vmem>>, vector<1x16x128xbf16>
    %72 = vector.shape_cast %71 : vector<1x16x128xbf16> to vector<16x128xbf16>
    %73 = vector.shape_cast %69 : vector<16x128xbf16> to vector<1x16x128xbf16>
    tpu.vector_store %arg7[%70, %c0_29, %c0_30], %73 {strides = array<i32>} : memref<8x16x128xbf16, #tpu.memory_space<vmem>>, vector<1x16x128xbf16>,
    %c6_i32 = arith.constant 6 : i32
    %74 = arith.truncf %68 : vector<16x128xf32> to vector<16x128xbf16>
    %cst_31 = arith.constant dense<0.000000e+00> : vector<16x128xf32>
    %75 = tpu.matmul %74, %0, %cst_31 {dimension_numbers = #tpu.dot_dimension_numbers<[1], [0], [0], [1], [0, 0, 1, 1], [], []>} : vector<16x128xbf16>, vector<128x128xbf16>, vector<16x128xf32> -> vector<16x128xf32>
    %76 = arith.index_cast %c6_i32 : i32 to index
    %c0_32 = arith.constant 0 : index
    %c0_33 = arith.constant 0 : index
    %77 = vector.load %arg1[%76, %c0_32, %c0_33] : memref<8x16x128xbf16, #tpu.memory_space<vmem>>, vector<1x16x128xbf16>
    %78 = vector.shape_cast %77 : vector<1x16x128xbf16> to vector<16x128xbf16>
    %79 = arith.extf %78 : vector<16x128xbf16> to vector<16x128xf32>
    %80 = arith.addf %79, %75 : vector<16x128xf32>
    %81 = math.tanh %80 : vector<16x128xf32>
    %82 = arith.truncf %81 : vector<16x128xf32> to vector<16x128xbf16>
    %83 = arith.index_cast %c6_i32 : i32 to index
    %c0_34 = arith.constant 0 : index
    %c0_35 = arith.constant 0 : index
    %84 = vector.load %arg7[%83, %c0_34, %c0_35] : memref<8x16x128xbf16, #tpu.memory_space<vmem>>, vector<1x16x128xbf16>
    %85 = vector.shape_cast %84 : vector<1x16x128xbf16> to vector<16x128xbf16>
    %86 = vector.shape_cast %82 : vector<16x128xbf16> to vector<1x16x128xbf16>
    tpu.vector_store %arg7[%83, %c0_34, %c0_35], %86 {strides = array<i32>} : memref<8x16x128xbf16, #tpu.memory_space<vmem>>, vector<1x16x128xbf16>,
    %c7_i32 = arith.constant 7 : i32
    %87 = arith.truncf %81 : vector<16x128xf32> to vector<16x128xbf16>
    %cst_36 = arith.constant dense<0.000000e+00> : vector<16x128xf32>
    %88 = tpu.matmul %87, %0, %cst_36 {dimension_numbers = #tpu.dot_dimension_numbers<[1], [0], [0], [1], [0, 0, 1, 1], [], []>} : vector<16x128xbf16>, vector<128x128xbf16>, vector<16x128xf32> -> vector<16x128xf32>
    %89 = arith.index_cast %c7_i32 : i32 to index
    %c0_37 = arith.constant 0 : index
    %c0_38 = arith.constant 0 : index
    %90 = vector.load %arg1[%89, %c0_37, %c0_38] : memref<8x16x128xbf16, #tpu.memory_space<vmem>>, vector<1x16x128xbf16>
    %91 = vector.shape_cast %90 : vector<1x16x128xbf16> to vector<16x128xbf16>
    %92 = arith.extf %91 : vector<16x128xbf16> to vector<16x128xf32>
    %93 = arith.addf %92, %88 : vector<16x128xf32>
    %94 = math.tanh %93 : vector<16x128xf32>
    %95 = arith.truncf %94 : vector<16x128xf32> to vector<16x128xbf16>
    %96 = arith.index_cast %c7_i32 : i32 to index
    %c0_39 = arith.constant 0 : index
    %c0_40 = arith.constant 0 : index
    %97 = vector.load %arg7[%96, %c0_39, %c0_40] : memref<8x16x128xbf16, #tpu.memory_space<vmem>>, vector<1x16x128xbf16>
    %98 = vector.shape_cast %97 : vector<1x16x128xbf16> to vector<16x128xbf16>
    %99 = vector.shape_cast %95 : vector<16x128xbf16> to vector<1x16x128xbf16>
    tpu.vector_store %arg7[%96, %c0_39, %c0_40], %99 {strides = array<i32>} : memref<8x16x128xbf16, #tpu.memory_space<vmem>>, vector<1x16x128xbf16>,
    %c7_i32_41 = arith.constant 7 : i32
    %c0_42 = arith.constant 0 : index
    %c0_43 = arith.constant 0 : index
    %100 = vector.load %arg4[%c0_42, %c0_43] : memref<128x11xbf16, #tpu.memory_space<vmem>>, vector<128x11xbf16>
    %c0_44 = arith.constant 0 : index
    %c0_45 = arith.constant 0 : index
    %c0_46 = arith.constant 0 : index
    %101 = vector.load %arg7[%c0_44, %c0_45, %c0_46] : memref<8x16x128xbf16, #tpu.memory_space<vmem>>, vector<8x16x128xbf16>
    %102 = vector.shape_cast %101 : vector<8x16x128xbf16> to vector<128x128xbf16>
    %103 = vector.extract_strided_slice %100 {offsets = [0, 0], sizes = [128, 4], strides = [1, 1]} : vector<128x11xbf16> to vector<128x4xbf16>
    %cst_47 = arith.constant dense<0.000000e+00> : vector<128x4xf32>
    %104 = tpu.matmul %102, %103, %cst_47 {dimension_numbers = #tpu.dot_dimension_numbers<[1], [0], [0], [1], [0, 0, 1, 1], [], []>} : vector<128x128xbf16>, vector<128x4xbf16>, vector<128x4xf32> -> vector<128x4xf32>
    %105 = vector.shape_cast %104 : vector<128x4xf32> to vector<8x16x4xf32>
    %c0_48 = arith.constant 0 : index
    %c0_49 = arith.constant 0 : index
    %c0_50 = arith.constant 0 : index
    %106 = vector.load %arg2[%c0_48, %c0_49, %c0_50] : memref<8x16x4xf32, #tpu.memory_space<vmem>>, vector<8x16x4xf32>
    %cst_51 = arith.constant 0.000000e+00 : f32
    %107 = vector.broadcast %cst_51 : f32 to vector<8x16x4xf32>
    %108 = arith.cmpf oeq, %106, %107 : vector<8x16x4xf32>
    %cst_52 = arith.constant -1.000000e+09 : f32
    %109 = vector.broadcast %cst_52 : f32 to vector<8x16x4xf32>
    %110 = arith.select %108, %109, %105 : vector<8x16x4xi1>, vector<8x16x4xf32>
    %cst_53 = arith.constant dense<0xFF800000> : vector<16x4xf32>
    %111 = vector.multi_reduction <maximumf>, %110, %cst_53 [0] : vector<8x16x4xf32> to vector<16x4xf32>
    %112 = vector.shape_cast %111 : vector<16x4xf32> to vector<1x16x4xf32>
    %113 = vector.broadcast %112 : vector<1x16x4xf32> to vector<8x16x4xf32>
    %114 = arith.subf %110, %113 : vector<8x16x4xf32>
    %115 = math.exp %114 : vector<8x16x4xf32>
    %cst_54 = arith.constant dense<0.000000e+00> : vector<16x4xf32>
    %116 = vector.multi_reduction <add>, %115, %cst_54 [0] : vector<8x16x4xf32> to vector<16x4xf32>
    %117 = vector.shape_cast %116 : vector<16x4xf32> to vector<1x16x4xf32>
    %118 = vector.broadcast %117 : vector<1x16x4xf32> to vector<8x16x4xf32>
    %119 = arith.divf %115, %118 : vector<8x16x4xf32>
    %120 = tpu.iota {dimensions = array<i32: 1>} : vector<4x128xi32>
    %121 = tpu.iota {dimensions = array<i32: 0>} : vector<4x128xi32>
    %c32_i32 = arith.constant 32 : i32
    %122 = vector.broadcast %c32_i32 : i32 to vector<4x128xi32>
    %123 = arith.muli %121, %122 : vector<4x128xi32>
    %124 = arith.cmpi sge, %120, %123 : vector<4x128xi32>
    %c1_i32_55 = arith.constant 1 : i32
    %125 = vector.broadcast %c1_i32_55 : i32 to vector<4x128xi32>
    %126 = arith.addi %121, %125 : vector<4x128xi32>
    %c32_i32_56 = arith.constant 32 : i32
    %127 = vector.broadcast %c32_i32_56 : i32 to vector<4x128xi32>
    %128 = arith.muli %126, %127 : vector<4x128xi32>
    %129 = arith.cmpi slt, %120, %128 : vector<4x128xi32>
    %130 = arith.andi %124, %129 : vector<4x128xi1>
    %131 = arith.extui %130 : vector<4x128xi1> to vector<4x128xi32>
    %132 = arith.sitofp %131 : vector<4x128xi32> to vector<4x128xf32>
    %133 = arith.truncf %132 : vector<4x128xf32> to vector<4x128xbf16>
    %134 = vector.shape_cast %119 : vector<8x16x4xf32> to vector<128x4xf32>
    %135 = arith.truncf %134 : vector<128x4xf32> to vector<128x4xbf16>
    %cst_57 = arith.constant dense<0.000000e+00> : vector<128x128xf32>
    %136 = tpu.matmul %135, %133, %cst_57 {dimension_numbers = #tpu.dot_dimension_numbers<[1], [0], [0], [1], [0, 0, 1, 1], [], []>} : vector<128x4xbf16>, vector<4x128xbf16>, vector<128x128xf32> -> vector<128x128xf32>
    %137 = vector.shape_cast %136 : vector<128x128xf32> to vector<8x16x128xf32>
    %c0_58 = arith.constant 0 : index
    %c0_59 = arith.constant 0 : index
    %c0_60 = arith.constant 0 : index
    %138 = vector.load %arg7[%c0_58, %c0_59, %c0_60] : memref<8x16x128xbf16, #tpu.memory_space<vmem>>, vector<8x16x128xbf16>
    %139 = arith.extf %138 : vector<8x16x128xbf16> to vector<8x16x128xf32>
    %140 = arith.mulf %137, %139 : vector<8x16x128xf32>
    %cst_61 = arith.constant dense<0.000000e+00> : vector<16x128xf32>
    %141 = vector.multi_reduction <add>, %140, %cst_61 [0] : vector<8x16x128xf32> to vector<16x128xf32>
    %142 = arith.truncf %141 : vector<16x128xf32> to vector<16x128xbf16>
    %143 = vector.extract_strided_slice %100 {offsets = [0, 4], sizes = [128, 4], strides = [1, 1]} : vector<128x11xbf16> to vector<128x4xbf16>
    %cst_62 = arith.constant dense<0.000000e+00> : vector<16x4xf32>
    %144 = tpu.matmul %142, %143, %cst_62 {dimension_numbers = #tpu.dot_dimension_numbers<[1], [0], [0], [1], [0, 0, 1, 1], [], []>} : vector<16x128xbf16>, vector<128x4xbf16>, vector<16x4xf32> -> vector<16x4xf32>
    %cst_63 = arith.constant dense<0xFF800000> : vector<16xf32>
    %145 = vector.multi_reduction <maximumf>, %144, %cst_63 [1] : vector<16x4xf32> to vector<16xf32>
    %146 = vector.shape_cast %145 : vector<16xf32> to vector<16x1xf32>
    %147 = vector.broadcast %146 : vector<16x1xf32> to vector<16x4xf32>
    %148 = arith.subf %144, %147 : vector<16x4xf32>
    %149 = math.exp %148 : vector<16x4xf32>
    %cst_64 = arith.constant dense<0.000000e+00> : vector<16xf32>
    %150 = vector.multi_reduction <add>, %149, %cst_64 [1] : vector<16x4xf32> to vector<16xf32>
    %151 = vector.shape_cast %150 : vector<16xf32> to vector<16x1xf32>
    %152 = vector.broadcast %151 : vector<16x1xf32> to vector<16x4xf32>
    %153 = arith.divf %149, %152 : vector<16x4xf32>
    %154 = arith.truncf %153 : vector<16x4xf32> to vector<16x4xbf16>
    %cst_65 = arith.constant dense<0.000000e+00> : vector<16x128xf32>
    %155 = tpu.matmul %154, %133, %cst_65 {dimension_numbers = #tpu.dot_dimension_numbers<[1], [0], [0], [1], [0, 0, 1, 1], [], []>} : vector<16x4xbf16>, vector<4x128xbf16>, vector<16x128xf32> -> vector<16x128xf32>
    %156 = arith.mulf %141, %155 : vector<16x128xf32>
    %157 = arith.truncf %156 : vector<16x128xf32> to vector<16x128xbf16>
    %158 = vector.extract_strided_slice %100 {offsets = [0, 8], sizes = [128, 3], strides = [1, 1]} : vector<128x11xbf16> to vector<128x3xbf16>
    %cst_66 = arith.constant dense<0.000000e+00> : vector<16x3xf32>
    %159 = tpu.matmul %157, %158, %cst_66 {dimension_numbers = #tpu.dot_dimension_numbers<[1], [0], [0], [1], [0, 0, 1, 1], [], []>} : vector<16x128xbf16>, vector<128x3xbf16>, vector<16x3xf32> -> vector<16x3xf32>
    %c0_67 = arith.constant 0 : index
    %c0_68 = arith.constant 0 : index
    %160 = vector.load %arg5[%c0_67, %c0_68] : memref<1x3xf32, #tpu.memory_space<vmem>>, vector<1x3xf32>
    %161 = vector.broadcast %160 : vector<1x3xf32> to vector<16x3xf32>
    %162 = arith.addf %159, %161 : vector<16x3xf32>
    %163 = vector.extract_strided_slice %162 {offsets = [0, 0], sizes = [16, 1], strides = [1, 1]} : vector<16x3xf32> to vector<16x1xf32>
    %164 = vector.extract_strided_slice %162 {offsets = [0, 1], sizes = [16, 2], strides = [1, 1]} : vector<16x3xf32> to vector<16x2xf32>
    %cst_69 = arith.constant dense<0xFF800000> : vector<16xf32>
    %165 = vector.multi_reduction <maximumf>, %164, %cst_69 [1] : vector<16x2xf32> to vector<16xf32>
    %166 = vector.shape_cast %165 : vector<16xf32> to vector<16x1xf32>
    %167 = vector.broadcast %166 : vector<16x1xf32> to vector<16x2xf32>
    %168 = arith.subf %164, %167 : vector<16x2xf32>
    %169 = math.exp %168 : vector<16x2xf32>
    %cst_70 = arith.constant dense<0.000000e+00> : vector<16xf32>
    %170 = vector.multi_reduction <add>, %169, %cst_70 [1] : vector<16x2xf32> to vector<16xf32>
    %171 = vector.shape_cast %170 : vector<16xf32> to vector<16x1xf32>
    %172 = vector.broadcast %171 : vector<16x1xf32> to vector<16x2xf32>
    %173 = arith.divf %169, %172 : vector<16x2xf32>
    %c0_71 = arith.constant 0 : index
    %c0_72 = arith.constant 0 : index
    %174 = vector.load %arg6[%c0_71, %c0_72] : memref<16x40xf32, #tpu.memory_space<vmem>>, vector<16x1xf32>
    tpu.vector_store %arg6[%c0_71, %c0_72], %163 {strides = array<i32>} : memref<16x40xf32, #tpu.memory_space<vmem>>, vector<16x1xf32>,
    %175 = arith.negf %163 : vector<16x1xf32>
    %176 = math.exp %175 : vector<16x1xf32>
    %cst_73 = arith.constant 1.000000e+00 : f32
    %177 = vector.broadcast %cst_73 : f32 to vector<16x1xf32>
    %178 = arith.addf %177, %176 : vector<16x1xf32>
    %179 = arith.divf %177, %178 : vector<16x1xf32>
    %c0_74 = arith.constant 0 : index
    %c1 = arith.constant 1 : index
    %180 = vector.load %arg6[%c0_74, %c1] : memref<16x40xf32, #tpu.memory_space<vmem>>, vector<16x1xf32>
    tpu.vector_store %arg6[%c0_74, %c1], %179 {strides = array<i32>} : memref<16x40xf32, #tpu.memory_space<vmem>>, vector<16x1xf32>,
    %c0_75 = arith.constant 0 : index
    %c2 = arith.constant 2 : index
    %181 = vector.load %arg6[%c0_75, %c2] : memref<16x40xf32, #tpu.memory_space<vmem>>, vector<16x2xf32>
    tpu.vector_store %arg6[%c0_75, %c2], %173 {strides = array<i32>} : memref<16x40xf32, #tpu.memory_space<vmem>>, vector<16x2xf32>,
    %c0_76 = arith.constant 0 : index
    %c4 = arith.constant 4 : index
    %182 = vector.load %arg6[%c0_76, %c4] : memref<16x40xf32, #tpu.memory_space<vmem>>, vector<16x4xf32>
    tpu.vector_store %arg6[%c0_76, %c4], %153 {strides = array<i32>} : memref<16x40xf32, #tpu.memory_space<vmem>>, vector<16x4xf32>,
    %183 = vector.extract_strided_slice %119 {offsets = [0, 0, 0], sizes = [1, 16, 4], strides = [1, 1, 1]} : vector<8x16x4xf32> to vector<1x16x4xf32>
    %184 = vector.shape_cast %183 : vector<1x16x4xf32> to vector<16x4xf32>
    %c0_77 = arith.constant 0 : index
    %c8 = arith.constant 8 : index
    %185 = vector.load %arg6[%c0_77, %c8] : memref<16x40xf32, #tpu.memory_space<vmem>>, vector<16x4xf32>
    tpu.vector_store %arg6[%c0_77, %c8], %184 {strides = array<i32>} : memref<16x40xf32, #tpu.memory_space<vmem>>, vector<16x4xf32>,
    %186 = vector.extract_strided_slice %119 {offsets = [1, 0, 0], sizes = [1, 16, 4], strides = [1, 1, 1]} : vector<8x16x4xf32> to vector<1x16x4xf32>
    %187 = vector.shape_cast %186 : vector<1x16x4xf32> to vector<16x4xf32>
    %c0_78 = arith.constant 0 : index
    %c12 = arith.constant 12 : index
    %188 = vector.load %arg6[%c0_78, %c12] : memref<16x40xf32, #tpu.memory_space<vmem>>, vector<16x4xf32>
    tpu.vector_store %arg6[%c0_78, %c12], %187 {strides = array<i32>} : memref<16x40xf32, #tpu.memory_space<vmem>>, vector<16x4xf32>,
    %189 = vector.extract_strided_slice %119 {offsets = [2, 0, 0], sizes = [1, 16, 4], strides = [1, 1, 1]} : vector<8x16x4xf32> to vector<1x16x4xf32>
    %190 = vector.shape_cast %189 : vector<1x16x4xf32> to vector<16x4xf32>
    %c0_79 = arith.constant 0 : index
    %c16 = arith.constant 16 : index
    %191 = vector.load %arg6[%c0_79, %c16] : memref<16x40xf32, #tpu.memory_space<vmem>>, vector<16x4xf32>
    tpu.vector_store %arg6[%c0_79, %c16], %190 {strides = array<i32>} : memref<16x40xf32, #tpu.memory_space<vmem>>, vector<16x4xf32>,
    %192 = vector.extract_strided_slice %119 {offsets = [3, 0, 0], sizes = [1, 16, 4], strides = [1, 1, 1]} : vector<8x16x4xf32> to vector<1x16x4xf32>
    %193 = vector.shape_cast %192 : vector<1x16x4xf32> to vector<16x4xf32>
    %c0_80 = arith.constant 0 : index
    %c20 = arith.constant 20 : index
    %194 = vector.load %arg6[%c0_80, %c20] : memref<16x40xf32, #tpu.memory_space<vmem>>, vector<16x4xf32>
    tpu.vector_store %arg6[%c0_80, %c20], %193 {strides = array<i32>} : memref<16x40xf32, #tpu.memory_space<vmem>>, vector<16x4xf32>,
    %195 = vector.extract_strided_slice %119 {offsets = [4, 0, 0], sizes = [1, 16, 4], strides = [1, 1, 1]} : vector<8x16x4xf32> to vector<1x16x4xf32>
    %196 = vector.shape_cast %195 : vector<1x16x4xf32> to vector<16x4xf32>
    %c0_81 = arith.constant 0 : index
    %c24 = arith.constant 24 : index
    %197 = vector.load %arg6[%c0_81, %c24] : memref<16x40xf32, #tpu.memory_space<vmem>>, vector<16x4xf32>
    tpu.vector_store %arg6[%c0_81, %c24], %196 {strides = array<i32>} : memref<16x40xf32, #tpu.memory_space<vmem>>, vector<16x4xf32>,
    %198 = vector.extract_strided_slice %119 {offsets = [5, 0, 0], sizes = [1, 16, 4], strides = [1, 1, 1]} : vector<8x16x4xf32> to vector<1x16x4xf32>
    %199 = vector.shape_cast %198 : vector<1x16x4xf32> to vector<16x4xf32>
    %c0_82 = arith.constant 0 : index
    %c28 = arith.constant 28 : index
    %200 = vector.load %arg6[%c0_82, %c28] : memref<16x40xf32, #tpu.memory_space<vmem>>, vector<16x4xf32>
    tpu.vector_store %arg6[%c0_82, %c28], %199 {strides = array<i32>} : memref<16x40xf32, #tpu.memory_space<vmem>>, vector<16x4xf32>,
    %201 = vector.extract_strided_slice %119 {offsets = [6, 0, 0], sizes = [1, 16, 4], strides = [1, 1, 1]} : vector<8x16x4xf32> to vector<1x16x4xf32>
    %202 = vector.shape_cast %201 : vector<1x16x4xf32> to vector<16x4xf32>
    %c0_83 = arith.constant 0 : index
    %c32 = arith.constant 32 : index
    %203 = vector.load %arg6[%c0_83, %c32] : memref<16x40xf32, #tpu.memory_space<vmem>>, vector<16x4xf32>
    tpu.vector_store %arg6[%c0_83, %c32], %202 {strides = array<i32>} : memref<16x40xf32, #tpu.memory_space<vmem>>, vector<16x4xf32>,
    %204 = vector.extract_strided_slice %119 {offsets = [7, 0, 0], sizes = [1, 16, 4], strides = [1, 1, 1]} : vector<8x16x4xf32> to vector<1x16x4xf32>
    %205 = vector.shape_cast %204 : vector<1x16x4xf32> to vector<16x4xf32>
    %c0_84 = arith.constant 0 : index
    %c36 = arith.constant 36 : index
    %206 = vector.load %arg6[%c0_84, %c36] : memref<16x40xf32, #tpu.memory_space<vmem>>, vector<16x4xf32>
    tpu.vector_store %arg6[%c0_84, %c36], %205 {strides = array<i32>} : memref<16x40xf32, #tpu.memory_space<vmem>>, vector<16x4xf32>,
    return
  }
  func.func @transform_0(%arg0: i32) -> (i32, i32, i32) {
    %c0_i32 = arith.constant 0 : i32
    %c0_i32_0 = arith.constant 0 : i32
    %c0_i32_1 = arith.constant 0 : i32
    return %c0_i32, %arg0, %c0_i32_0 : i32, i32, i32
  }
  func.func @transform_1(%arg0: i32) -> (i32, i32, i32) {
    %c0_i32 = arith.constant 0 : i32
    %c0_i32_0 = arith.constant 0 : i32
    %c0_i32_1 = arith.constant 0 : i32
    return %c0_i32, %arg0, %c0_i32_0 : i32, i32, i32
  }
  func.func @transform_2(%arg0: i32) -> (i32, i32) {
    %c0_i32 = arith.constant 0 : i32
    %c0_i32_0 = arith.constant 0 : i32
    %c0_i32_1 = arith.constant 0 : i32
    return %c0_i32, %c0_i32_0 : i32, i32
  }
  func.func @transform_3(%arg0: i32) -> (i32, i32) {
    %c0_i32 = arith.constant 0 : i32
    %c0_i32_0 = arith.constant 0 : i32
    %c0_i32_1 = arith.constant 0 : i32
    return %c0_i32, %c0_i32_0 : i32, i32
  }
  func.func @transform_4(%arg0: i32) -> (i32, i32) {
    %c0_i32 = arith.constant 0 : i32
    %c0_i32_0 = arith.constant 0 : i32
    %c0_i32_1 = arith.constant 0 : i32
    return %c0_i32, %c0_i32_0 : i32, i32
  }
  func.func @transform_5(%arg0: i32) -> (i32, i32) {
    %c0_i32 = arith.constant 0 : i32
    %c0_i32_0 = arith.constant 0 : i32
    return %arg0, %c0_i32 : i32, i32
  }
}

</mosaic_0001>

<bundles_post_ra>
// kernel: tpu_custom_call.1
= control target key start
LH: loop header
LB: loop body
LE: loop exit
PB: predicated region body
PF: predicated region fallthrough
CT: control target
= control target key end

     0   :  { %10 = vsyncpa [#allocation6], 0  ;;  %s3335_s0 = inlined_call_operand.vmem [shape: bf16[8,32,128], index: 0, kind: input, shape index: {}]   ;;  %s3336_s1 = inlined_call_operand.vmem [shape: f32[8,32,4], index: 1, kind: input, shape index: {}]   ;;  %s3337_s2 = inlined_call_operand.vmem [shape: bf16[128,128], index: 2, kind: input, shape index: {}]   ;;  %s3338_s3 = inlined_call_operand.vmem [shape: bf16[128,11], index: 3, kind: input, shape index: {}]   ;;  %s3339_s4 = inlined_call_operand.vmem [shape: f32[1,3], index: 4, kind: input, shape index: {}]   ;;  %s3340_s5 = inlined_call_operand.hbm [shape: f32[32,40], index: 5, kind: output, shape index: {}]  }
   0x1   :  { %12 = vsyncpa [#allocation6 + $0x1], 0  ;;  %s2621_s18 = smov 0   ;;  %s2623_s19 = smov 0  }
   0x2   :  { %s2625_s20 = smov 0   ;;  %s2627_s21 = smov 0  }
   0x3 LB: > { %s1898_s22 = sadd.s32 4294967295, %s2572_s21   ;;  %s1899_s23 = sadd.s32 4294967294, %s2572_s21   ;;  %s2572_s21 = sphi %s2627_s21, %s3347_s21   ;;  %s2568_s20 = sphi %s2625_s20, %s3346_s20   ;;  %s2564_s19 = sphi %s2623_s19, %s3345_s19   ;;  %s2560_s18 = sphi %s2621_s18, %s3344_s18  }
   0x4   : > { %s2644_s24 = sadd.s32 1, %s2572_s21   ;;  %s25_s25 = sadd.s32 1, %s2568_s20 }
   0x5   : > { %s22_s26 = ssub.s32 %s2572_s21, %s2644_s24  ;;  %p32_p0 = scmp.ne.s32.totalorder %s2568_s20, %s2564_s19 }
   0x6   : > { %p23_p1 = scmp.eq.s32.totalorder %s22_s26, 0  ;;  %p33_p2 = scmp.eq.s32.totalorder %s2572_s21, 0 }
   0x7   : > { %p151_p3 = scmp.eq.s32.totalorder %s1898_s22, 1  ;;  %p156_p4 = scmp.ne.s32.totalorder %s2564_s19, %s2560_s18 }
   0x8   : > { %s2657_s27 = scalar_select %p23_p1, %s2568_s20, %s25_s25  }
   0x9   : > { %p2659_p5 = por %p33_p2, %p32_p0  ;;  %p2663_p6 = por %p151_p3, %p32_p0 }
   0xa   : > { %p157_p7 = scmp.eq.s32.totalorder %s1899_s23, 1  ;;  %p1901_p9 = scmp.ge.s32.totalorder %s2572_s21, 2 }
   0xc   : > { %p2667_p8 = por %p157_p7, %p156_p4  ;;  %182 = sbr.rel (%p1901_p9) target bundleno = 39 (0x27), region = 28 }
  0x13   : > { %185 = sbr.rel (!%p2659_p5) target bundleno = 27 (0x1b), region = 32  ;;  %s187_s6 = sand.u32 (%p2659_p5), 1, %s2568_s20  }
  0x14   : > { %s1960_s7 = sshll.u32 (%p2659_p5), %s2572_s21, 3  ;;  %s1902_s8 = sshll.u32 (%p2659_p5), %s187_s6, 6 }
  0x15   : > { %s192_s11 = scalar_lea.vmem (%p2659_p5), %s3335_s0, %s1960_s7  ;;  %s189_s12 = scalar_lea.vmem (%p2659_p5), [#allocation3], %s1902_s8 }
  0x16   : > { %v208_v0 = vld [vmem:[%s192_s11] sm:$0xff] (%p2659_p5)   ;;  %v212_v1 = vld [vmem:[%s192_s11 + $0x10] sm:$0xff] (%p2659_p5)  }
  0x17   : > { %v216_v2 = vld [vmem:[%s192_s11 + $0x20] sm:$0xff] (%p2659_p5)   ;;  %209 = vst [vmem:[%s189_s12] sm:$0xff] (%p2659_p5), %v208_v0   ;;  %213 = vst [vmem:[%s189_s12 + $0x8] sm:$0xff] (%p2659_p5), %v212_v1   ;;  %v220_v3 = vld [vmem:[%s192_s11 + $0x30] sm:$0xff] (%p2659_p5)  }
  0x18   : > { %217 = vst [vmem:[%s189_s12 + $0x10] sm:$0xff] (%p2659_p5), %v216_v2   ;;  %v224_v4 = vld [vmem:[%s192_s11 + $0x40] sm:$0xff] (%p2659_p5)   ;;  %v228_v5 = vld [vmem:[%s192_s11 + $0x50] sm:$0xff] (%p2659_p5)   ;;  %221 = vst [vmem:[%s189_s12 + $0x18] sm:$0xff] (%p2659_p5), %v220_v3  }
  0x19   : > { %225 = vst [vmem:[%s189_s12 + $0x20] sm:$0xff] (%p2659_p5), %v224_v4   ;;  %229 = vst [vmem:[%s189_s12 + $0x28] sm:$0xff] (%p2659_p5), %v228_v5   ;;  %v232_v6 = vld [vmem:[%s192_s11 + $0x60] sm:$0xff] (%p2659_p5)   ;;  %v236_v7 = vld [vmem:[%s192_s11 + $0x70] sm:$0xff] (%p2659_p5)  }
  0x1a   : > { %233 = vst [vmem:[%s189_s12 + $0x30] sm:$0xff] %v232_v6   ;;  %237 = vst [vmem:[%s189_s12 + $0x38] sm:$0xff] %v236_v7  }
  0x1b PF: > { %294 = sbr.rel (!%p2659_p5) target bundleno = 39 (0x27), region = 73  ;;  %s296_s13 = sand.u32 (%p2659_p5), 1, %s2568_s20  }
  0x1c   : > { %s1961_s14 = sshll.u32 (%p2659_p5), %s2572_s21, 4  ;;  %s1905_s15 = sshll.u32 (%p2659_p5), %s296_s13, 7 }
  0x1d   : > { %s2688_s23 = scalar_lea.vmem (%p2659_p5), %s3336_s1, %s1961_s14  ;;  %s298_s25 = scalar_lea.vmem (%p2659_p5), [#allocation4], %s1905_s15 }
  0x1e   : > { %v359_v8 = vld [vmem:[%s2688_s23] sm:$0xff] (%p2659_p5)  ;;  %v361_v9 = vld [vmem:[%s2688_s23 + $0x8] sm:$0xff] (%p2659_p5) }
  0x1f   : > { %v363_v10 = vld [vmem:[%s2688_s23 + $0x20] sm:$0xff] (%p2659_p5)  ;;  %360 = vst [vmem:[%s298_s25] sm:$0xff] (%p2659_p5), %v359_v8  ;;  %362 = vst [vmem:[%s298_s25 + $0x8] sm:$0xff] (%p2659_p5), %v361_v9  ;;  %v365_v11 = vld [vmem:[%s2688_s23 + $0x28] sm:$0xff] (%p2659_p5) }
  0x20   : > { %364 = vst [vmem:[%s298_s25 + $0x10] sm:$0xff] (%p2659_p5), %v363_v10  ;;  %v367_v12 = vld [vmem:[%s2688_s23 + $0x40] sm:$0xff] (%p2659_p5)  ;;  %v369_v13 = vld [vmem:[%s2688_s23 + $0x48] sm:$0xff] (%p2659_p5)  ;;  %366 = vst [vmem:[%s298_s25 + $0x18] sm:$0xff] (%p2659_p5), %v365_v11 }
  0x21   : > { %368 = vst [vmem:[%s298_s25 + $0x20] sm:$0xff] (%p2659_p5), %v367_v12  ;;  %370 = vst [vmem:[%s298_s25 + $0x28] sm:$0xff] (%p2659_p5), %v369_v13  ;;  %v371_v14 = vld [vmem:[%s2688_s23 + $0x60] sm:$0xff] (%p2659_p5)  ;;  %v373_v15 = vld [vmem:[%s2688_s23 + $0x68] sm:$0xff] (%p2659_p5) }
  0x22   : > { %v375_v16 = vld [vmem:[%s2688_s23 + $0x80] sm:$0xff]  ;;  %372 = vst [vmem:[%s298_s25 + $0x30] sm:$0xff] %v371_v14  ;;  %374 = vst [vmem:[%s298_s25 + $0x38] sm:$0xff] %v373_v15  ;;  %v377_v17 = vld [vmem:[%s2688_s23 + $0x88] sm:$0xff] }
  0x23   : > { %376 = vst [vmem:[%s298_s25 + $0x40] sm:$0xff] %v375_v16  ;;  %v379_v18 = vld [vmem:[%s2688_s23 + $0xa0] sm:$0xff]  ;;  %v381_v19 = vld [vmem:[%s2688_s23 + $0xa8] sm:$0xff]  ;;  %378 = vst [vmem:[%s298_s25 + $0x48] sm:$0xff] %v377_v17 }
  0x24   : > { %380 = vst [vmem:[%s298_s25 + $0x50] sm:$0xff] %v379_v18  ;;  %382 = vst [vmem:[%s298_s25 + $0x58] sm:$0xff] %v381_v19  ;;  %v383_v20 = vld [vmem:[%s2688_s23 + $0xc0] sm:$0xff]  ;;  %v385_v21 = vld [vmem:[%s2688_s23 + $0xc8] sm:$0xff] }
  0x25   : > { %v387_v22 = vld [vmem:[%s2688_s23 + $0xe0] sm:$0xff]  ;;  %384 = vst [vmem:[%s298_s25 + $0x60] sm:$0xff] %v383_v20  ;;  %386 = vst [vmem:[%s298_s25 + $0x68] sm:$0xff] %v385_v21  ;;  %v389_v23 = vld [vmem:[%s2688_s23 + $0xe8] sm:$0xff] }
  0x26   : > { %388 = vst [vmem:[%s298_s25 + $0x70] sm:$0xff] %v387_v22  ;;  %390 = vst [vmem:[%s298_s25 + $0x78] sm:$0xff] %v389_v23 }
  0x27 PF: > { %p1908_p10 = scmp.ge.s32.totalorder %s2572_s21, 1  ;;  %p395_p11 = scmp.lt.s32.totalorder %s2572_s21, 3 }
  0x29   : > { %p396_p12 = pnand %p1908_p10, %p395_p11 }
  0x2a   : > { %v2711_v24 = vld [vmem:[%s3337_s2] sm:$0xff] (!%p396_p12)   ;;  %v2574_v25 = vmov (!%p396_p12), 0.0   ;;  %v2719_v26 = vld [vmem:[%s3337_s2 + $0x8] sm:$0xff] (!%p396_p12)   ;;  %vm2575_vm0 = vmmov (!%p396_p12), 0   ;;  %s2724_s8 = sand.u32 (!%p396_p12), 1, %s2564_s19   ;;  %v2736_v27 = vld [vmem:[%s3337_s2 + $0x10] sm:$0xff] (!%p396_p12)  }
  0x2b   : > { %399 = sbr.rel (%p396_p12) target bundleno = 3740 (0xe9c), region = 111  ;;  %2110 = vmatprep.subr.bf16.mxu0 (!%p396_p12), %v2574_v25  ;;  %2130 = vmatprep.subr.bf16.mxu1 (!%p396_p12), %v2574_v25  ;;  %s1909_s9 = sshll.u32 (!%p396_p12), %s2724_s8, 6  ;;  %v2743_v28 = vld [vmem:[%s3337_s2 + $0x18] sm:$0xff] (!%p396_p12)   ;;  %v2757_v32 = vld [vmem:[%s3337_s2 + $0x20] sm:$0xff] (!%p396_p12)   ;;  %v2766_v33 = vld [vmem:[%s3337_s2 + $0x28] sm:$0xff] (!%p396_p12)   ;;  %vm1104_vm3 = vcmask (!%p396_p12), 31744  }
  0x2c   : > { %2111 = vmatpush3.bf16.msra.mxu0 (!%p396_p12), %v2711_v24  ;;  %2126 = vmatprep.mubr.msk.bf16.mxu0 (!%p396_p12), %vm2575_vm0, %v2574_v25  ;;  %s2745_s14 = scalar_lea.vmem (!%p396_p12), [#allocation3], %s1909_s9  ;;  %v2775_v34 = vld [vmem:[%s3337_s2 + $0x30] sm:$0xff] (!%p396_p12)   ;;  %v2784_v37 = vld [vmem:[%s3337_s2 + $0x38] sm:$0xff] (!%p396_p12)   ;;  %v2903_v23 = vld [vmem:[%s3338_s3] sm:$0xff] (!%p396_p12)   ;;  %s1910_s10 = sshll.u32 (!%p396_p12), %s2724_s8, 7 }
  0x2d   : > { %2112 = vmatprep.subr.bf16.mxu0 (!%p396_p12), %v2574_v25  ;;  %2131 = vmatpush3.bf16.msra.mxu1 (!%p396_p12), %v2711_v24  ;;  %v1964_v29 = vld [vmem:[%s2745_s14] sm:$0xff] (!%p396_p12)   ;;  %v1995_v39 = vld [vmem:[%s2745_s14 + $0x8] sm:$0xff] (!%p396_p12)   ;;  %v1996_v51 = vld [vmem:[%s2745_s14 + $0x10] sm:$0xff] (!%p396_p12)   ;;  %s2973_s11 = scalar_lea.vmem (!%p396_p12), [#allocation4], %s1910_s10  ;;  %s2577_s12 = smov (!%p396_p12), 120  }
  0x2e   : > { %2132 = vmatprep.subr.bf16.mxu1 (!%p396_p12), %v2574_v25  ;;  %2146 = vmatprep.mubr.msk.bf16.mxu1 (!%p396_p12), %vm2575_vm0, %v2574_v25  ;;  %v1965_v30 = vunpack.c.l.bf16 (!%p396_p12), %v1964_v29  ;;  %v1966_v31 = vunpack.c.h.bf16 (!%p396_p12), %v1964_v29  ;;  %v1969_v40 = vunpack.c.l.bf16 (!%p396_p12), %v1995_v39  ;;  %v1970_v41 = vunpack.c.h.bf16 (!%p396_p12), %v1995_v39  ;;  %v1997_v63 = vld [vmem:[%s2745_s14 + $0x18] sm:$0xff] (!%p396_p12)   ;;  %v1998_v11 = vld [vmem:[%s2745_s14 + $0x20] sm:$0xff] (!%p396_p12)   ;;  %v2921_v39 = vld [vmem:[%s3338_s3 + $0x10] sm:$0xff] (!%p396_p12)   ;;  %s1911_s13 = sshll.u32 (!%p396_p12), %s2724_s8, 4  ;;  %s2578_s23 = smov (!%p396_p12), 127  }
  0x2f   : > { %v1973_v52 = vunpack.c.l.bf16 (!%p396_p12), %v1996_v51  ;;  %v1974_v53 = vunpack.c.h.bf16 (!%p396_p12), %v1996_v51  ;;  %v1977_v0 = vunpack.c.l.bf16 (!%p396_p12), %v1997_v63  ;;  %v1978_v1 = vunpack.c.h.bf16 (!%p396_p12), %v1997_v63  ;;  %s3230_s17 = scalar_lea.vmem (!%p396_p12), [#allocation5], %s1911_s13  ;;  %s2579_s25 = smov (!%p396_p12), 1  }
  0x30   : > { %2113 = vmatpush3.bf16.msra.mxu0 (!%p396_p12), %v2719_v26  ;;  %2418 = vtanh.f32 (!%p396_p12), %v1965_v30  ;;  %v1981_v12 = vunpack.c.l.bf16 (!%p396_p12), %v1998_v11  ;;  %v1982_v13 = vunpack.c.h.bf16 (!%p396_p12), %v1998_v11  ;;  %s2580_s26 = smov (!%p396_p12), 4   ;;  %s2581_s28 = smov (!%p396_p12), 8  }
  0x31   : > { %2114 = vmatprep.subr.bf16.mxu0 (!%p396_p12), %v2574_v25  ;;  %2133 = vmatpush3.bf16.msra.mxu1 (!%p396_p12), %v2719_v26  ;;  %2420 = vtanh.f32 (!%p396_p12), %v1966_v31  ;;  %s2582_s6 = smov (!%p396_p12), 12   ;;  %s2583_s7 = smov (!%p396_p12), 16  }
  0x32   : > { %2134 = vmatprep.subr.bf16.mxu1 %v2574_v25  ;;  %s2584_s9 = smov 20   ;;  %s2585_s10 = smov 24  }
  0x33   : > { %s1962_s13 = sshll.u32 %s1898_s22, 8  ;;  %s1813_s15 = sshll.u32 %s3230_s17, 4  ;;  %s3289_s15 = int_to_ptr.vmem [resolvable:$true] %s1813_s15 }
  0x34   : > { %2115 = vmatpush3.bf16.msra.mxu0 %v2736_v27  ;;  %s1800_s22 = scalar_lea.sflag [#allocation6], %s2724_s8 }
  0x35   : > { %2116 = vmatprep.subr.bf16.mxu0 %v2574_v25  ;;  %2135 = vmatpush3.bf16.msra.mxu1 %v2736_v27 }
  0x36   : > { %2136 = vmatprep.subr.bf16.mxu1 %v2574_v25 }
  0x38   : > { %2117 = vmatpush3.bf16.msra.mxu0 %v2743_v28 }
  0x39   : > { %2118 = vmatprep.subr.bf16.mxu0 %v2574_v25  ;;  %2137 = vmatpush3.bf16.msra.mxu1 %v2743_v28 }
  0x3a   : > { %2138 = vmatprep.subr.bf16.mxu1 %v2574_v25  ;;  %v2419_v35 = vpop.eup %2418 }
  0x3b   : > { %v2421_v36 = vpop.eup %2420 }
  0x3c   : > { %2119 = vmatpush3.bf16.msra.mxu0 %v2757_v32  ;;  %v2789_v38 = vpack.c.bf16 %v2421_v36, %v2419_v35 }
  0x3d   : > { %2120 = vmatprep.subr.bf16.mxu0 %v2574_v25  ;;  %2139 = vmatpush3.bf16.msra.mxu1 %v2757_v32 }
  0x3e   : > { %2140 = vmatprep.subr.bf16.mxu1 %v2574_v25 }
  0x40   : > { %2121 = vmatpush3.bf16.msra.mxu0 %v2766_v33 }
  0x41   : > { %2122 = vmatprep.subr.bf16.mxu0 %v2574_v25  ;;  %2141 = vmatpush3.bf16.msra.mxu1 %v2766_v33 }
  0x42   : > { %2142 = vmatprep.subr.bf16.mxu1 %v2574_v25 }
  0x44   : > { %2123 = vmatpush3.bf16.msra.mxu0 %v2775_v34 }
  0x45   : > { %2124 = vmatprep.subr.bf16.mxu0 %v2574_v25  ;;  %2143 = vmatpush3.bf16.msra.mxu1 %v2775_v34 }
  0x46   : > { %2144 = vmatprep.subr.bf16.mxu1 %v2574_v25 }
  0x48   : > { %2125 = vmatpush3.bf16.msra.mxu0 %v2784_v37 }
  0x49   : > { %2145 = vmatpush3.bf16.msra.mxu1 %v2784_v37  ;;  %2150 = vmatprep.subr.bf16.mxu0 %v2574_v25 }
  0x4a   : > { %2170 = vmatprep.subr.bf16.mxu1 %v2574_v25 }
  0x4b   : > { %2127 = vmatmul.mubr.bf16.vlgmr.msra.gmra.mrb[0].mxu0 %v2789_v38 }
  0x4c   : > { %2151 = vmatpush3.bf16.msra.mxu0 %v2711_v24  ;;  %2166 = vmatprep.mubr.msk.bf16.mxu0 %vm2575_vm0, %v2574_v25 }
  0x4d   : > { %2152 = vmatprep.subr.bf16.mxu0 %v2574_v25 }
  0x50   : > { %2153 = vmatpush3.bf16.msra.mxu0 %v2719_v26 }
  0x51   : > { %2154 = vmatprep.subr.bf16.mxu0 %v2574_v25 }
  0x54   : > { %2155 = vmatpush3.bf16.msra.mxu0 %v2736_v27 }
  0x55   : > { %2156 = vmatprep.subr.bf16.mxu0 %v2574_v25 }
  0x58   : > { %2157 = vmatpush3.bf16.msra.mxu0 %v2743_v28 }
  0x59   : > { %2158 = vmatprep.subr.bf16.mxu0 %v2574_v25 }
  0x5c   : > { %2159 = vmatpush3.bf16.msra.mxu0 %v2757_v32 }
  0x5d   : > { %2160 = vmatprep.subr.bf16.mxu0 %v2574_v25 }
  0x60   : > { %2161 = vmatpush3.bf16.msra.mxu0 %v2766_v33 }
  0x61   : > { %2162 = vmatprep.subr.bf16.mxu0 %v2574_v25 }
  0x64   : > { %2163 = vmatpush3.bf16.msra.mxu0 %v2775_v34 }
  0x65   : > { %2164 = vmatprep.subr.bf16.mxu0 %v2574_v25 }
  0x68   : > { %2165 = vmatpush3.bf16.msra.mxu0 %v2784_v37 }
  0x69   : > { %2190 = vmatprep.subr.bf16.mxu0 %v2574_v25 }
 0x11e   : > { %v550_v42 = vpop.f32.mrb[0].mxu0 }
 0x11f   : > { %v562_v43 = vadd.f32 %v1969_v40, %v550_v42  ;;  %v2128_v44 = vpop.f32.mrb[1].mxu0  ;;  %v2928_v40 = vld [vmem:[%s3338_s3 + $0x18] sm:$0xff]   ;;  %v2942_v42 = vld [vmem:[%s3338_s3 + $0x28] sm:$0xff]  }
 0x120   : > { %v553_v45 = vpop.f32.mrb[2].mxu0  ;;  %v2956_v44 = vld [vmem:[%s3338_s3 + $0x38] sm:$0xff]  }
 0x121   : > { %v563_v46 = vadd.f32 %v1970_v41, %v553_v45  ;;  %v2129_v47 = vpop.f32.mrb[3].mxu0  ;;  %2422 = vtanh.f32 %v562_v43  ;;  %v2935_v41 = vld [vmem:[%s3338_s3 + $0x20] sm:$0xff]   ;;  %v2949_v43 = vld [vmem:[%s3338_s3 + $0x30] sm:$0xff]  }
 0x122   : > { %v2000_v45 = vld [vmem:[%s2745_s14 + $0x30] sm:$0xff]  }
 0x123   : > { %2424 = vtanh.f32 %v563_v46  ;;  %v1989_v46 = vunpack.c.l.bf16 %v2000_v45  ;;  %v1990_v47 = vunpack.c.h.bf16 %v2000_v45  ;;  %v1067_v45 = vld [vmem:[%s2973_s11 + $0x58] sm:$0xff] }
 0x124   : > { %vm1083_vm12 = vcmp.eq.f32.partialorder %v1067_v45, 0.0  ;;  %v1070_v45 = vld [vmem:[%s2973_s11 + $0x70] sm:$0xff] }
 0x12b   : > { %v2423_v48 = vpop.eup %2422 }
 0x12d   : > { %v2425_v49 = vpop.eup %2424 }
 0x12e   : > { %v2815_v50 = vpack.c.bf16 %v2425_v49, %v2423_v48 }
 0x130   : > { %2147 = vmatmul.mubr.bf16.vlgmr.msra.gmra.mrb[0].mxu1 %v2815_v50 }
 0x131   : > { %2171 = vmatpush3.bf16.msra.mxu1 %v2711_v24  ;;  %2186 = vmatprep.mubr.msk.bf16.mxu1 %vm2575_vm0, %v2574_v25 }
 0x132   : > { %2172 = vmatprep.subr.bf16.mxu1 %v2574_v25 }
 0x135   : > { %2173 = vmatpush3.bf16.msra.mxu1 %v2719_v26 }
 0x136   : > { %2174 = vmatprep.subr.bf16.mxu1 %v2574_v25 }
 0x139   : > { %2175 = vmatpush3.bf16.msra.mxu1 %v2736_v27 }
 0x13a   : > { %2176 = vmatprep.subr.bf16.mxu1 %v2574_v25 }
 0x13d   : > { %2177 = vmatpush3.bf16.msra.mxu1 %v2743_v28 }
 0x13e   : > { %2178 = vmatprep.subr.bf16.mxu1 %v2574_v25 }
 0x141   : > { %2179 = vmatpush3.bf16.msra.mxu1 %v2757_v32 }
 0x142   : > { %2180 = vmatprep.subr.bf16.mxu1 %v2574_v25 }
 0x145   : > { %2181 = vmatpush3.bf16.msra.mxu1 %v2766_v33 }
 0x146   : > { %2182 = vmatprep.subr.bf16.mxu1 %v2574_v25 }
 0x149   : > { %2183 = vmatpush3.bf16.msra.mxu1 %v2775_v34 }
 0x14a   : > { %2184 = vmatprep.subr.bf16.mxu1 %v2574_v25 }
 0x14d   : > { %2185 = vmatpush3.bf16.msra.mxu1 %v2784_v37 }
 0x14e   : > { %2210 = vmatprep.subr.bf16.mxu1 %v2574_v25 }
 0x203   : > { %v603_v54 = vpop.f32.mrb[0].mxu1 }
 0x204   : > { %v615_v55 = vadd.f32 %v1973_v52, %v603_v54  ;;  %v2148_v56 = vpop.f32.mrb[1].mxu1 }
 0x205   : > { %v606_v57 = vpop.f32.mrb[2].mxu1 }
 0x206   : > { %v616_v58 = vadd.f32 %v1974_v53, %v606_v57  ;;  %v2149_v59 = vpop.f32.mrb[3].mxu1  ;;  %2426 = vtanh.f32 %v615_v55 }
 0x207   : > { %v1058_v59 = vld [vmem:[%s2973_s11 + $0x10] sm:$0xff] }
 0x208   : > { %2428 = vtanh.f32 %v616_v58  ;;  %vm1074_vm1 = vcmp.eq.f32.partialorder %v1058_v59, 0.0 }
 0x210   : > { %v2427_v60 = vpop.eup %2426 }
 0x212   : > { %v2429_v61 = vpop.eup %2428 }
 0x213   : > { %v2837_v62 = vpack.c.bf16 %v2429_v61, %v2427_v60  ;;  %v1056_v61 = vld [vmem:[%s2973_s11] sm:$0xff] }
 0x214   : > { %vm1072_vm2 = vcmp.eq.f32.partialorder %v1056_v61, 0.0 }
 0x215   : > { %2167 = vmatmul.mubr.bf16.vlgmr.msra.gmra.mrb[4].mxu0 %v2837_v62 }
 0x216   : > { %2191 = vmatpush3.bf16.msra.mxu0 %v2711_v24  ;;  %2206 = vmatprep.mubr.msk.bf16.mxu0 %vm2575_vm0, %v2574_v25 }
 0x217   : > { %2192 = vmatprep.subr.bf16.mxu0 %v2574_v25 }
 0x21a   : > { %2193 = vmatpush3.bf16.msra.mxu0 %v2719_v26 }
 0x21b   : > { %2194 = vmatprep.subr.bf16.mxu0 %v2574_v25 }
 0x21e   : > { %2195 = vmatpush3.bf16.msra.mxu0 %v2736_v27 }
 0x21f   : > { %2196 = vmatprep.subr.bf16.mxu0 %v2574_v25 }
 0x222   : > { %2197 = vmatpush3.bf16.msra.mxu0 %v2743_v28 }
 0x223   : > { %2198 = vmatprep.subr.bf16.mxu0 %v2574_v25 }
 0x226   : > { %2199 = vmatpush3.bf16.msra.mxu0 %v2757_v32 }
 0x227   : > { %2200 = vmatprep.subr.bf16.mxu0 %v2574_v25 }
 0x22a   : > { %2201 = vmatpush3.bf16.msra.mxu0 %v2766_v33 }
 0x22b   : > { %2202 = vmatprep.subr.bf16.mxu0 %v2574_v25 }
 0x22e   : > { %2203 = vmatpush3.bf16.msra.mxu0 %v2775_v34 }
 0x22f   : > { %2204 = vmatprep.subr.bf16.mxu0 %v2574_v25 }
 0x232   : > { %2205 = vmatpush3.bf16.msra.mxu0 %v2784_v37 }
 0x233   : > { %2230 = vmatprep.subr.bf16.mxu0 %v2574_v25 }
 0x2e8   : > { %v656_v2 = vpop.f32.mrb[4].mxu0 }
 0x2e9   : > { %v668_v3 = vadd.f32 %v1977_v0, %v656_v2  ;;  %v2168_v4 = vpop.f32.mrb[5].mxu0  ;;  %v1059_v0 = vld [vmem:[%s2973_s11 + $0x18] sm:$0xff]  ;;  %v1062_v2 = vld [vmem:[%s2973_s11 + $0x30] sm:$0xff] }
 0x2ea   : > { %v659_v5 = vpop.f32.mrb[6].mxu0  ;;  %v1060_v4 = vld [vmem:[%s2973_s11 + $0x20] sm:$0xff]  ;;  %vm1075_vm4 = vcmp.eq.f32.partialorder %v1059_v0, 0.0  ;;  %vm1078_vm5 = vcmp.eq.f32.partialorder %v1062_v2, 0.0 }
 0x2eb   : > { %v669_v6 = vadd.f32 %v1978_v1, %v659_v5  ;;  %v2169_v7 = vpop.f32.mrb[7].mxu0  ;;  %2430 = vtanh.f32 %v668_v3  ;;  %v1057_v3 = vld [vmem:[%s2973_s11 + $0x8] sm:$0xff]  ;;  %v1063_v5 = vld [vmem:[%s2973_s11 + $0x38] sm:$0xff]  ;;  %vm1076_vm7 = vcmp.eq.f32.partialorder %v1060_v4, 0.0 }
 0x2ec   : > { %vm1073_vm6 = vcmp.eq.f32.partialorder %v1057_v3, 0.0  ;;  %vm1079_vm8 = vcmp.eq.f32.partialorder %v1063_v5, 0.0  ;;  %v2001_v3 = vld [vmem:[%s2745_s14 + $0x38] sm:$0xff]  }
 0x2ed   : > { %2432 = vtanh.f32 %v669_v6  ;;  %v1061_v6 = vld [vmem:[%s2973_s11 + $0x28] sm:$0xff]  ;;  %v1993_v4 = vunpack.c.l.bf16 %v2001_v3  ;;  %v1994_v5 = vunpack.c.h.bf16 %v2001_v3 }
 0x2ee   : > { %vm1077_vm9 = vcmp.eq.f32.partialorder %v1061_v6, 0.0 }
 0x2f5   : > { %v2431_v8 = vpop.eup %2430 }
 0x2f7   : > { %v2433_v9 = vpop.eup %2432 }
 0x2f8   : > { %v2859_v10 = vpack.c.bf16 %v2433_v9, %v2431_v8 }
 0x2fa   : > { %2187 = vmatmul.mubr.bf16.vlgmr.msra.gmra.mrb[4].mxu1 %v2859_v10 }
 0x2fb   : > { %2211 = vmatpush3.bf16.msra.mxu1 %v2711_v24  ;;  %2226 = vmatprep.mubr.msk.bf16.mxu1 %vm2575_vm0, %v2574_v25 }
 0x2fc   : > { %2212 = vmatprep.subr.bf16.mxu1 %v2574_v25 }
 0x2ff   : > { %2213 = vmatpush3.bf16.msra.mxu1 %v2719_v26 }
 0x300   : > { %2214 = vmatprep.subr.bf16.mxu1 %v2574_v25 }
 0x303   : > { %2215 = vmatpush3.bf16.msra.mxu1 %v2736_v27 }
 0x304   : > { %2216 = vmatprep.subr.bf16.mxu1 %v2574_v25 }
 0x307   : > { %2217 = vmatpush3.bf16.msra.mxu1 %v2743_v28 }
 0x308   : > { %2218 = vmatprep.subr.bf16.mxu1 %v2574_v25 }
 0x30b   : > { %2219 = vmatpush3.bf16.msra.mxu1 %v2757_v32 }
 0x30c   : > { %2220 = vmatprep.subr.bf16.mxu1 %v2574_v25 }
 0x30f   : > { %2221 = vmatpush3.bf16.msra.mxu1 %v2766_v33 }
 0x310   : > { %2222 = vmatprep.subr.bf16.mxu1 %v2574_v25 }
 0x313   : > { %2223 = vmatpush3.bf16.msra.mxu1 %v2775_v34 }
 0x314   : > { %2224 = vmatprep.subr.bf16.mxu1 %v2574_v25 }
 0x317   : > { %2225 = vmatpush3.bf16.msra.mxu1 %v2784_v37 }
 0x318   : > { %2250 = vmatprep.subr.bf16.mxu1 %v2903_v23 }
 0x3cd   : > { %v709_v14 = vpop.f32.mrb[4].mxu1 }
 0x3ce   : > { %v721_v15 = vadd.f32 %v1981_v12, %v709_v14  ;;  %v2188_v16 = vpop.f32.mrb[5].mxu1 }
 0x3cf   : > { %v712_v17 = vpop.f32.mrb[6].mxu1 }
 0x3d0   : > { %v722_v18 = vadd.f32 %v1982_v13, %v712_v17  ;;  %v2189_v19 = vpop.f32.mrb[7].mxu1  ;;  %2434 = vtanh.f32 %v721_v15 }
 0x3d2   : > { %2436 = vtanh.f32 %v722_v18 }
 0x3da   : > { %v2435_v20 = vpop.eup %2434 }
 0x3dc   : > { %v2437_v21 = vpop.eup %2436 }
 0x3dd   : > { %v2880_v22 = vpack.c.bf16 %v2437_v21, %v2435_v20 }
 0x3df   : > { %2207 = vmatmul.mubr.bf16.vlgmr.msra.gmra.mrb[8].mxu0 %v2880_v22 }
 0x3e0   : > { %2231 = vmatpush3.bf16.msra.mxu0 %v2711_v24  ;;  %2246 = vmatprep.mubr.msk.bf16.mxu0 %vm2575_vm0, %v2574_v25  ;;  %v1999_v24 = vld [vmem:[%s2745_s14 + $0x28] sm:$0xff]   ;;  %s2576_s14 = smov 124  }
 0x3e1   : > { %2232 = vmatprep.subr.bf16.mxu0 %v2574_v25  ;;  %1424 = vrot.lane.b32.xlu0 %v2903_v23, %s2576_s14 }
 0x3e2   : > { %1428 = vrot.lane.b32.xlu1 %v2921_v39, %s2576_s14 }
 0x3e4   : > { %2233 = vmatpush3.bf16.msra.mxu0 %v2719_v26  ;;  %v1985_v26 = vunpack.c.l.bf16 %v1999_v24 }
 0x3e5   : > { %2234 = vmatprep.subr.bf16.mxu0 %v2574_v25 }
 0x3e6   : > { %1430 = vrot.lane.b32.xlu1 %v2928_v40, %s2576_s14 }
 0x3e8   : > { %2235 = vmatpush3.bf16.msra.mxu0 %v2736_v27  ;;  %v1986_v27 = vunpack.c.h.bf16 %v1999_v24 }
 0x3e9   : > { %2236 = vmatprep.subr.bf16.mxu0 %v2574_v25 }
 0x3ea   : > { %1434 = vrot.lane.b32.xlu1 %v2942_v42, %s2576_s14 }
 0x3ec   : > { %2237 = vmatpush3.bf16.msra.mxu0 %v2743_v28 }
 0x3ed   : > { %2238 = vmatprep.subr.bf16.mxu0 %v2574_v25 }
 0x3ee   : > { %1438 = vrot.lane.b32.xlu1 %v2956_v44, %s2576_s14 }
 0x3f0   : > { %2239 = vmatpush3.bf16.msra.mxu0 %v2757_v32 }
 0x3f1   : > { %2240 = vmatprep.subr.bf16.mxu0 %v2574_v25 }
 0x3f4   : > { %2241 = vmatpush3.bf16.msra.mxu0 %v2766_v33 }
 0x3f5   : > { %2242 = vmatprep.subr.bf16.mxu0 %v2574_v25 }
 0x3f8   : > { %2243 = vmatpush3.bf16.msra.mxu0 %v2775_v34 }
 0x3f9   : > { %2244 = vmatprep.subr.bf16.mxu0 %v2574_v25 }
 0x3fc   : > { %2245 = vmatpush3.bf16.msra.mxu0 %v2784_v37  ;;  %v2912_v37 = vld [vmem:[%s3338_s3 + $0x8] sm:$0xff]  }
 0x3fd   : > { %1426 = vrot.lane.b32.xlu0 %v2912_v37, %s2576_s14 }
 0x401   : > { %1432 = vrot.lane.b32.xlu0 %v2935_v41, %s2576_s14 }
 0x405   : > { %1436 = vrot.lane.b32.xlu0 %v2949_v43, %s2576_s14  ;;  %s2587_s14 = smov 32  }
 0x4b2   : > { %v762_v28 = vpop.f32.mrb[8].mxu0 }
 0x4b3   : > { %v774_v29 = vadd.f32 %v1985_v26, %v762_v28  ;;  %v2208_v30 = vpop.f32.mrb[9].mxu0 }
 0x4b4   : > { %v765_v31 = vpop.f32.mrb[10].mxu0 }
 0x4b5   : > { %v775_v32 = vadd.f32 %v1986_v27, %v765_v31  ;;  %v2209_v33 = vpop.f32.mrb[11].mxu0  ;;  %2438 = vtanh.f32 %v774_v29  ;;  %v1066_v27 = vld [vmem:[%s2973_s11 + $0x50] sm:$0xff] }
 0x4b6   : > { %vm1082_vm10 = vcmp.eq.f32.partialorder %v1066_v27, 0.0 }
 0x4b7   : > { %2440 = vtanh.f32 %v775_v32  ;;  %v1064_v32 = vld [vmem:[%s2973_s11 + $0x40] sm:$0xff] }
 0x4b8   : > { %vm1080_vm11 = vcmp.eq.f32.partialorder %v1064_v32, 0.0 }
 0x4bf   : > { %v2439_v34 = vpop.eup %2438 }
 0x4c1   : > { %v2441_v35 = vpop.eup %2440 }
 0x4c2   : > { %v2907_v36 = vpack.c.bf16 %v2441_v35, %v2439_v34 }
 0x4c4   : > { %2227 = vmatmul.mubr.bf16.vlgmr.msra.gmra.mrb[8].mxu1 %v2907_v36 }
 0x4c5   : > { %2251 = vmatpush3.bf16.msra.mxu1 %v2903_v23  ;;  %2266 = vmatprep.mubr.bf16.mxu1 %v2789_v38 }
 0x4c6   : > { %2252 = vmatprep.subr.bf16.mxu1 %v2912_v37 }
 0x4c9   : > { %2253 = vmatpush3.bf16.msra.mxu1 %v2912_v37 }
 0x4ca   : > { %2254 = vmatprep.subr.bf16.mxu1 %v2921_v39 }
 0x4cd   : > { %2255 = vmatpush3.bf16.msra.mxu1 %v2921_v39 }
 0x4ce   : > { %2256 = vmatprep.subr.bf16.mxu1 %v2928_v40 }
 0x4d1   : > { %2257 = vmatpush3.bf16.msra.mxu1 %v2928_v40 }
 0x4d2   : > { %2258 = vmatprep.subr.bf16.mxu1 %v2935_v41 }
 0x4d5   : > { %2259 = vmatpush3.bf16.msra.mxu1 %v2935_v41 }
 0x4d6   : > { %2260 = vmatprep.subr.bf16.mxu1 %v2942_v42 }
 0x4d9   : > { %2261 = vmatpush3.bf16.msra.mxu1 %v2942_v42 }
 0x4da   : > { %2262 = vmatprep.subr.bf16.mxu1 %v2949_v43 }
 0x4dd   : > { %2263 = vmatpush3.bf16.msra.mxu1 %v2949_v43 }
 0x4de   : > { %2264 = vmatprep.subr.bf16.mxu1 %v2956_v44 }
 0x4e1   : > { %2265 = vmatpush3.bf16.msra.mxu1 %v2956_v44 }
 0x4e2   : > { %2326 = vmatprep.subr.bf16.mxu1 %v2574_v25 }
 0x4e4   : > { %2267 = vmatmul.mubr.bf16.vlgmr.msra.gmra.mrb[12].mxu1 %v2815_v50 }
 0x4e5   : > { %2270 = vmatprep.mubr.bf16.mxu1 %v2837_v62 }
 0x4ec   : > { %2271 = vmatmul.mubr.bf16.gmra.mrb[16].mxu1 %v2859_v10 }
 0x4ed   : > { %2274 = vmatprep.mubr.bf16.mxu1 %v2880_v22 }
 0x4f4   : > { %2275 = vmatmul.mubr.bf16.gmra.mrb[20].mxu1 %v2907_v36 }
 0x597   : > { %v815_v48 = vpop.f32.mrb[8].mxu1 }
 0x598   : > { %v827_v49 = vadd.f32 %v1989_v46, %v815_v48  ;;  %v2228_v51 = vpop.f32.mrb[9].mxu1 }
 0x599   : > { %v818_v52 = vpop.f32.mrb[10].mxu1 }
 0x59a   : > { %v828_v53 = vadd.f32 %v1990_v47, %v818_v52  ;;  %v2229_v54 = vpop.f32.mrb[11].mxu1  ;;  %2442 = vtanh.f32 %v827_v49  ;;  %v1065_v47 = vld [vmem:[%s2973_s11 + $0x48] sm:$0xff] }
 0x59b   : > { %vm1081_vm13 = vcmp.eq.f32.partialorder %v1065_v47, 0.0  ;;  %v1071_v47 = vld [vmem:[%s2973_s11 + $0x78] sm:$0xff] }
 0x59c   : > { %2444 = vtanh.f32 %v828_v53 }
 0x5a4   : > { %v2443_v55 = vpop.eup %2442 }
 0x5a6   : > { %v2445_v56 = vpop.eup %2444 }
 0x5a7   : > { %v2968_v57 = vpack.c.bf16 %v2445_v56, %v2443_v55 }
 0x5a9   : > { %2247 = vmatmul.mubr.bf16.vlgmr.msra.gmra.mrb[12].mxu0 %v2968_v57  ;;  %2278 = vmatprep.mubr.bf16.mxu1 %v2968_v57 }
 0x5b7   : > { %v2268_v58 = vpop.f32.mrb[12].mxu1 }
 0x5b8   : > { %v993_v60 = vpop.f32.mrb[13].mxu1  ;;  %v2983_v7 = vsel %vm1074_vm1, -1e+09, %v2268_v58 }
 0x5b9   : > { %v2269_v63 = vpop.f32.mrb[14].mxu1  ;;  %v2985_v8 = vsel %vm1072_vm2, -1e+09, %v993_v60  ;;  %v1106_v11 = vsel %vm1104_vm3, %v2983_v7, -inf  ;;  %vm1276_vm2 = vcmask 1041408  }
 0x5ba   : > { %v996_v1 = vpop.f32.mrb[15].mxu1  ;;  %v2989_v12 = vsel %vm1075_vm4, -1e+09, %v2269_v63  ;;  %v1105_v19 = vsel %vm1104_vm3, %v2985_v8, -inf  ;;  %vm1086_vm4 = vcmp.eq.f32.partialorder %v1070_v45, 0.0 }
 0x5bb   : > { %v2993_v15 = vsel %vm1073_vm6, -1e+09, %v996_v1  ;;  %v1121_v28 = vsel %vm1104_vm3, %v2989_v12, -inf  ;;  %vm1087_vm6 = vcmp.eq.f32.partialorder %v1071_v47, 0.0 }
 0x5bc   : > { %v1120_v33 = vsel %vm1104_vm3, %v2993_v15, -inf }
 0x5bf   : > { %v2272_v9 = vpop.f32.mrb[16].mxu1 }
 0x5c0   : > { %v2991_v13 = vsel %vm1078_vm5, -1e+09, %v2272_v9  ;;  %v1009_v14 = vpop.f32.mrb[17].mxu1 }
 0x5c1   : > { %v1109_v16 = vsel %vm1104_vm3, %v2991_v13, -inf  ;;  %v2997_v17 = vsel %vm1076_vm7, -1e+09, %v1009_v14  ;;  %v2273_v18 = vpop.f32.mrb[18].mxu1 }
 0x5c2   : > { %v1110_v20 = vmax.f32 %v1106_v11, %v1109_v16  ;;  %v1107_v21 = vsel %vm1104_vm3, %v2997_v17, -inf  ;;  %v3003_v24 = vsel %vm1079_vm8, -1e+09, %v2273_v18  ;;  %v1012_v26 = vpop.f32.mrb[19].mxu1  ;;  %vm1652_vm8 = vcmask 15360  }
 0x5c3   : > { %v1108_v29 = vmax.f32 %v1105_v19, %v1107_v21  ;;  %v1124_v30 = vsel %vm1104_vm3, %v3003_v24, -inf  ;;  %v3011_v31 = vsel %vm1077_vm9, -1e+09, %v1012_v26  ;;  %v1231_v26 = vlaneseq }
 0x5c4   : > { %v1125_v34 = vmax.f32 %v1121_v28, %v1124_v30  ;;  %v1122_v35 = vsel %vm1104_vm3, %v3011_v31, -inf  ;;  %vm1686_vm9 = vcmask 15368  }
 0x5c5   : > { %v1123_v46 = vmax.f32 %v1120_v33, %v1122_v35  ;;  %v1232_v27 = vand.u32 127, %v1231_v26  ;;  %v1234_v28 = vshrl.u32 %v1231_v26, 7 }
 0x5c7   : > { %v2276_v48 = vpop.f32.mrb[20].mxu1  ;;  %v1237_v30 = vadd.s32 1, %v1234_v28 }
 0x5c8   : > { %v3020_v49 = vsel %vm1082_vm10, -1e+09, %v2276_v48  ;;  %v1025_v51 = vpop.f32.mrb[21].mxu1  ;;  %v1069_v48 = vld [vmem:[%s2973_s11 + $0x68] sm:$0xff]  ;;  %vm1697_vm10 = vcmask 31760  }
 0x5c9   : > { %v1113_v52 = vsel %vm1104_vm3, %v3020_v49, -inf  ;;  %v3024_v53 = vsel %vm1080_vm11, -1e+09, %v1025_v51  ;;  %v2277_v54 = vpop.f32.mrb[22].mxu1  ;;  %v1238_v32 = vmul.u32 32, %v1237_v30  ;;  %vm1085_vm7 = vcmp.eq.f32.partialorder %v1069_v48, 0.0 }
 0x5ca   : > { %v3026_v55 = vmax.f32 %v1110_v20, %v1113_v52  ;;  %v1111_v56 = vsel %vm1104_vm3, %v3024_v53, -inf  ;;  %v3030_v58 = vsel %vm1083_vm12, -1e+09, %v2277_v54  ;;  %v1028_v59 = vpop.f32.mrb[23].mxu1  ;;  %vm1708_vm11 = vcmask 64544  }
 0x5cb   : > { %v3032_v60 = vmax.f32 %v1108_v29, %v1111_v56  ;;  %v1128_v61 = vsel %vm1104_vm3, %v3030_v58, -inf  ;;  %v3036_v63 = vsel %vm1081_vm13, -1e+09, %v1028_v59  ;;  %v1235_v29 = vmul.u32 32, %v1234_v28 }
 0x5cc   : > { %v3038_v0 = vmax.f32 %v1125_v34, %v1128_v61  ;;  %v1126_v1 = vsel %vm1104_vm3, %v3036_v63, -inf  ;;  %vm1239_vm15 = vcmp.lt.s32.totalorder %v1232_v27, %v1238_v32  ;;  %vm1719_vm12 = vcmask 97344  }
 0x5cd   : > { %v3042_v2 = vmax.f32 %v1123_v46, %v1126_v1  ;;  %vm1236_vm14 = vcmp.ge.s32.totalorder %v1232_v27, %v1235_v29  ;;  %v1068_v46 = vld [vmem:[%s2973_s11 + $0x60] sm:$0xff]  ;;  %s2586_s11 = smov 28   ;;  %vm1730_vm13 = vcmask 130144  }
 0x5ce   : > { %vm1240_vm1 = vmand %vm1236_vm14, %vm1239_vm15  ;;  %vm1084_vm5 = vcmp.eq.f32.partialorder %v1068_v46, 0.0  ;;  %vm1741_vm14 = vcmask 162944   ;;  %vm1752_vm15 = vcmask 195744  }
 0x5cf   : > { %v1942_v33 = vsel %vm1240_vm1, 1.0, %v2574_v25  ;;  %vm1763_vm1 = vcmask 228544  }
 0x5d0   : > { %v1243_v34 = vpack.c.bf16 %v1942_v33, %v1942_v33 }
 0x5d2   : > { %2346 = vmatprep.subr.msk.bf16.mxu0 %vm1276_vm2, %v1243_v34  ;;  %v3051_v35 = vsel %vm1276_vm2, %v1243_v34, 0  ;;  %vm1774_vm2 = vcmask 261344  }
 0x5d3   : > { %2283 = vmatpush3.bf16.msra.mxu0 %v3051_v35 }
 0x5d4   : > { %2300 = vmatprep.subr.bf16.mxu0 %v2574_v25 }
 0x67c   : > { %v868_v6 = vpop.f32.mrb[12].mxu0 }
 0x67d   : > { %v880_v9 = vadd.f32 %v1993_v4, %v868_v6  ;;  %v2248_v11 = vpop.f32.mrb[13].mxu0 }
 0x67e   : > { %v871_v14 = vpop.f32.mrb[14].mxu0 }
 0x67f   : > { %v881_v16 = vadd.f32 %v1994_v5, %v871_v14  ;;  %v2249_v18 = vpop.f32.mrb[15].mxu0  ;;  %2446 = vtanh.f32 %v880_v9 }
 0x681   : > { %2448 = vtanh.f32 %v881_v16 }
 0x689   : > { %v2447_v19 = vpop.eup %2446 }
 0x68b   : > { %v2449_v20 = vpop.eup %2448 }
 0x68c   : > { %v3045_v21 = vpack.c.bf16 %v2449_v20, %v2447_v19 }
 0x68e   : > { %2279 = vmatmul.mubr.bf16.gmra.mrb[24].mxu1 %v3045_v21 }
 0x68f   : > { %2342 = vmatprep.mubr.msk.bf16.mxu1 %vm2575_vm0, %v2574_v25 }
 0x761   : > { %v2280_v51 = vpop.f32.mrb[24].mxu1 }
 0x762   : > { %v1102_v52 = vsel %vm1086_vm4, -1e+09, %v2280_v51  ;;  %v1041_v54 = vpop.f32.mrb[25].mxu1  ;;  %vm1785_vm4 = vcmask 294144  }
 0x763   : > { %v1117_v56 = vsel %vm1104_vm3, %v1102_v52, -inf  ;;  %v1100_v59 = vsel %vm1084_vm5, -1e+09, %v1041_v54  ;;  %v2281_v61 = vpop.f32.mrb[26].mxu1  ;;  %vm1796_vm5 = vcmask 326944  }
 0x764   : > { %v1118_v1 = vmax.f32 %v3026_v55, %v1117_v56  ;;  %v1115_v3 = vsel %vm1104_vm3, %v1100_v59, -inf  ;;  %v3070_v4 = vsel %vm1087_vm6, -1e+09, %v2281_v61  ;;  %v1044_v5 = vpop.f32.mrb[27].mxu1 }
 0x765   : > { %v1116_v6 = vmax.f32 %v3032_v60, %v1115_v3  ;;  %v1132_v9 = vsel %vm1104_vm3, %v3070_v4, -inf  ;;  %v1101_v11 = vsel %vm1085_vm7, -1e+09, %v1044_v5 }
 0x766   : > { %v1133_v14 = vmax.f32 %v3038_v0, %v1132_v9  ;;  %v1130_v16 = vsel %vm1104_vm3, %v1101_v11, -inf }
 0x767   : > { %v1119_v18 = vmax.f32 %v1116_v6, %v1118_v1  ;;  %v1131_v19 = vmax.f32 %v3042_v2, %v1130_v16 }
 0x769   : > { %v1135_v55 = vsub.f32 %v2985_v8, %v1119_v18  ;;  %v1137_v20 = vsub.f32 %v2983_v7, %v1119_v18  ;;  %v1139_v26 = vsub.f32 %v2997_v17, %v1119_v18  ;;  %v1141_v27 = vsub.f32 %v2991_v13, %v1119_v18 }
 0x76a   : > { %v1143_v60 = vsub.f32 %v3024_v53, %v1119_v18  ;;  %v1145_v28 = vsub.f32 %v3020_v49, %v1119_v18  ;;  %v1147_v29 = vsub.f32 %v1100_v59, %v1119_v18  ;;  %v1149_v30 = vsub.f32 %v1102_v52, %v1119_v18 }
 0x76b   : > { %v1151_v0 = vmul.f32 1.442695, %v1135_v55  ;;  %v1155_v32 = vmul.f32 1.442695, %v1137_v20  ;;  %v1159_v33 = vmul.f32 1.442695, %v1139_v26  ;;  %v1134_v34 = vmax.f32 %v1131_v19, %v1133_v14 }
 0x76c   : > { %v1163_v45 = vmul.f32 1.442695, %v1141_v27  ;;  %v1167_v2 = vmul.f32 1.442695, %v1143_v60  ;;  %v1171_v8 = vmul.f32 1.442695, %v1145_v28 }
 0x76d   : > { %2450 = vpow2.f32 %v1151_v0  ;;  %v1175_v46 = vmul.f32 1.442695, %v1147_v29  ;;  %v1136_v7 = vsub.f32 %v2993_v15, %v1134_v34  ;;  %v1138_v13 = vsub.f32 %v2989_v12, %v1134_v34 }
 0x76e   : > { %2452 = vpow2.f32 %v1155_v32  ;;  %v1140_v17 = vsub.f32 %v3011_v31, %v1134_v34  ;;  %v1142_v49 = vsub.f32 %v3003_v24, %v1134_v34  ;;  %v1144_v53 = vsub.f32 %v3036_v63, %v1134_v34 }
 0x76f   : > { %2454 = vpow2.f32 %v1159_v33  ;;  %v1146_v47 = vsub.f32 %v3030_v58, %v1134_v34  ;;  %v1148_v48 = vsub.f32 %v1101_v11, %v1134_v34  ;;  %v1179_v51 = vmul.f32 1.442695, %v1149_v30 }
 0x770   : > { %2456 = vpow2.f32 %v1163_v45  ;;  %v1150_v52 = vsub.f32 %v3070_v4, %v1134_v34  ;;  %v1153_v54 = vmul.f32 1.442695, %v1136_v7  ;;  %v1157_v15 = vmul.f32 1.442695, %v1138_v13 }
 0x771   : > { %2458 = vpow2.f32 %v1167_v2  ;;  %v1161_v12 = vmul.f32 1.442695, %v1140_v17  ;;  %v1165_v31 = vmul.f32 1.442695, %v1142_v49  ;;  %v1169_v24 = vmul.f32 1.442695, %v1144_v53 }
 0x772   : > { %2460 = vpow2.f32 %v1171_v8  ;;  %v1173_v59 = vmul.f32 1.442695, %v1146_v47  ;;  %v1177_v5 = vmul.f32 1.442695, %v1148_v48  ;;  %v1181_v16 = vmul.f32 1.442695, %v1150_v52 }
 0x773   : > { %2462 = vpow2.f32 %v1175_v46 }
 0x774   : > { %2464 = vpow2.f32 %v1179_v51 }
 0x775   : > { %2466 = vpow2.f32 %v1153_v54 }
 0x776   : > { %2468 = vpow2.f32 %v1157_v15 }
 0x777   : > { %v2451_v56 = vpop.eup %2450  ;;  %2470 = vpow2.f32 %v1161_v12 }
 0x778   : > { %v2453_v63 = vpop.eup %2452  ;;  %v1183_v58 = vsel %vm1104_vm3, %v2451_v56, 0.0  ;;  %2472 = vpow2.f32 %v1165_v31 }
 0x779   : > { %v2455_v61 = vpop.eup %2454  ;;  %v1184_v1 = vsel %vm1104_vm3, %v2453_v63, 0.0  ;;  %2474 = vpow2.f32 %v1169_v24 }
 0x77a   : > { %v2457_v3 = vpop.eup %2456  ;;  %v1185_v4 = vadd.f32 %v1184_v1, %v1183_v58  ;;  %v1186_v9 = vsel %vm1104_vm3, %v2455_v61, 0.0  ;;  %2476 = vpow2.f32 %v1173_v59 }
 0x77b   : > { %v2459_v6 = vpop.eup %2458  ;;  %v1188_v19 = vsel %vm1104_vm3, %v2457_v3, 0.0  ;;  %2478 = vpow2.f32 %v1177_v5 }
 0x77c   : > { %v2461_v11 = vpop.eup %2460  ;;  %v1187_v14 = vadd.f32 %v1186_v9, %v1185_v4  ;;  %v1190_v27 = vsel %vm1104_vm3, %v2459_v6, 0.0  ;;  %2480 = vpow2.f32 %v1181_v16 }
 0x77d   : > { %v2463_v18 = vpop.eup %2462  ;;  %v1192_v0 = vsel %vm1104_vm3, %v2461_v11, 0.0 }
 0x77e   : > { %v2465_v55 = vpop.eup %2464  ;;  %v1189_v20 = vadd.f32 %v1188_v19, %v1187_v14  ;;  %v1194_v2 = vsel %vm1104_vm3, %v2463_v18, 0.0 }
 0x77f   : > { %v2467_v26 = vpop.eup %2466  ;;  %v1196_v17 = vsel %vm1104_vm3, %v2465_v55, 0.0 }
 0x780   : > { %v2469_v60 = vpop.eup %2468  ;;  %v1191_v28 = vadd.f32 %v1190_v27, %v1189_v20  ;;  %v1198_v29 = vsel %vm1104_vm3, %v2467_v26, 0.0 }
 0x781   : > { %v2471_v30 = vpop.eup %2470  ;;  %v1199_v32 = vsel %vm1104_vm3, %v2469_v60, 0.0 }
 0x782   : > { %v2473_v33 = vpop.eup %2472  ;;  %v1193_v34 = vadd.f32 %v1192_v0, %v1191_v28  ;;  %v1200_v45 = vadd.f32 %v1199_v32, %v1198_v29  ;;  %v1201_v8 = vsel %vm1104_vm3, %v2471_v30, 0.0 }
 0x783   : > { %v2475_v46 = vpop.eup %2474  ;;  %v1203_v49 = vsel %vm1104_vm3, %v2473_v33, 0.0 }
 0x784   : > { %v1195_v7 = vadd.f32 %v1194_v2, %v1193_v34  ;;  %v1202_v13 = vadd.f32 %v1201_v8, %v1200_v45  ;;  %v2477_v53 = vpop.eup %2476  ;;  %v1205_v51 = vsel %vm1104_vm3, %v2475_v46, 0.0  ;;  %v1425_v2 = vpop.permute.xlu0 %1424 }
 0x785   : > { %v2479_v52 = vpop.eup %2478  ;;  %v1207_v15 = vsel %vm1104_vm3, %v2477_v53, 0.0 }
 0x786   : > { %v1197_v47 = vadd.f32 %v1196_v17, %v1195_v7  ;;  %v1204_v48 = vadd.f32 %v1203_v49, %v1202_v13  ;;  %v2481_v12 = vpop.eup %2480  ;;  %v1209_v24 = vsel %vm1104_vm3, %v2479_v52, 0.0 }
 0x787   : > { %v1211_v59 = vsel %vm1104_vm3, %v2481_v12, 0.0 }
 0x788   : > { %2482 = vrcp.f32 %v1197_v47  ;;  %v1206_v54 = vadd.f32 %v1205_v51, %v1204_v48  ;;  %v1427_v8 = vpop.permute.xlu0 %1426  ;;  %v1377_v47 = vunpack.c.l.bf16 %v2789_v38  ;;  %v1379_v48 = vunpack.c.l.bf16 %v2815_v50 }
 0x78a   : > { %v1208_v31 = vadd.f32 %v1207_v15, %v1206_v54 }
 0x78c   : > { %v1210_v58 = vadd.f32 %v1209_v24, %v1208_v31  ;;  %v1433_v13 = vpop.permute.xlu0 %1432 }
 0x78e   : > { %v1212_v1 = vadd.f32 %v1211_v59, %v1210_v58 }
 0x790   : > { %2484 = vrcp.f32 %v1212_v1  ;;  %v1437_v49 = vpop.permute.xlu0 %1436 }
 0x792   : > { %v2483_v4 = vpop.eup %2482 }
 0x793   : > { %v3107_v5 = vmul.f32 %v2483_v4, %v2451_v56  ;;  %v3109_v9 = vmul.f32 %v2483_v4, %v2453_v63  ;;  %v3111_v14 = vmul.f32 %v2483_v4, %v2455_v61  ;;  %v3113_v16 = vmul.f32 %v2483_v4, %v2457_v3 }
 0x794   : > { %v3115_v19 = vmul.f32 %v2483_v4, %v2459_v6  ;;  %v3117_v20 = vmul.f32 %v2483_v4, %v2461_v11  ;;  %v3119_v27 = vmul.f32 %v2483_v4, %v2463_v18  ;;  %v3121_v28 = vmul.f32 %v2483_v4, %v2465_v55 }
 0x79a   : > { %v2485_v29 = vpop.eup %2484 }
 0x79b   : > { %v3123_v0 = vmul.f32 %v2485_v29, %v2467_v26  ;;  %v3125_v32 = vmul.f32 %v2485_v29, %v2469_v60  ;;  %v3127_v56 = vmul.f32 %v2485_v29, %v2471_v30  ;;  %v3129_v63 = vmul.f32 %v2485_v29, %v2473_v33 }
 0x79c   : > { %v3131_v61 = vmul.f32 %v2485_v29, %v2475_v46  ;;  %v3133_v3 = vmul.f32 %v2485_v29, %v2477_v53  ;;  %v3135_v6 = vmul.f32 %v2485_v29, %v2479_v52  ;;  %v3137_v11 = vmul.f32 %v2485_v29, %v2481_v12  ;;  %v1429_v46 = vpop.permute.xlu1 %1428 }
 0x79d   : > { %v1244_v18 = vpack.c.bf16 %v3123_v0, %v3107_v5  ;;  %v1245_v55 = vpack.c.bf16 %v3125_v32, %v3109_v9  ;;  %v1246_v26 = vpack.c.bf16 %v3127_v56, %v3111_v14  ;;  %v1247_v60 = vpack.c.bf16 %v3129_v63, %v3113_v16 }
 0x79e   : > { %v1248_v30 = vpack.c.bf16 %v3131_v61, %v3115_v19  ;;  %v1249_v33 = vpack.c.bf16 %v3133_v3, %v3117_v20  ;;  %v1250_v34 = vpack.c.bf16 %v3135_v6, %v3119_v27  ;;  %v1251_v45 = vpack.c.bf16 %v3137_v11, %v3121_v28 }
 0x79f   : > { %2284 = vmatprep.mubr.msk.bf16.mxu0 %vm1104_vm3, %v1244_v18  ;;  %v1378_v52 = vunpack.c.h.bf16 %v2789_v38  ;;  %v1380_v12 = vunpack.c.h.bf16 %v2815_v50  ;;  %v1382_v38 = vunpack.c.h.bf16 %v2837_v62 }
 0x7a0   : > { %2285 = vmatmul.mubr.msk.bf16.vlgmr.msra.gmra.mrb[16].mxu0 %vm1104_vm3, %v1245_v55  ;;  %v1431_v7 = vpop.permute.xlu1 %1430  ;;  %v1381_v55 = vunpack.c.l.bf16 %v2837_v62 }
 0x7a1   : > { %2288 = vmatprep.mubr.msk.bf16.mxu0 %vm1104_vm3, %v1246_v26  ;;  %2301 = vmatpush3.bf16.msra.mxu0 %v1425_v2  ;;  %v1384_v2 = vunpack.c.h.bf16 %v2859_v10 }
 0x7a2   : > { %2302 = vmatprep.subr.bf16.mxu0 %v2574_v25 }
 0x7a4   : > { %v1435_v17 = vpop.permute.xlu1 %1434 }
 0x7a5   : > { %2303 = vmatpush3.bf16.msra.mxu0 %v1427_v8 }
 0x7a6   : > { %2304 = vmatprep.subr.bf16.mxu0 %v2574_v25 }
 0x7a8   : > { %2289 = vmatmul.mubr.msk.bf16.gmra.mrb[20].mxu0 %vm1104_vm3, %v1247_v60  ;;  %v1439_v53 = vpop.permute.xlu1 %1438  ;;  %v1383_v60 = vunpack.c.l.bf16 %v2859_v10 }
 0x7a9   : > { %2292 = vmatprep.mubr.msk.bf16.mxu0 %vm1104_vm3, %v1248_v30  ;;  %2305 = vmatpush3.bf16.msra.mxu0 %v1429_v46 }
 0x7aa   : > { %2306 = vmatprep.subr.bf16.mxu0 %v2574_v25 }
 0x7ad   : > { %2307 = vmatpush3.bf16.msra.mxu0 %v1431_v7 }
 0x7ae   : > { %2308 = vmatprep.subr.bf16.mxu0 %v2574_v25 }
 0x7b0   : > { %2293 = vmatmul.mubr.msk.bf16.gmra.mrb[24].mxu0 %vm1104_vm3, %v1249_v33 }
 0x7b1   : > { %2296 = vmatprep.mubr.msk.bf16.mxu0 %vm1104_vm3, %v1250_v34  ;;  %2309 = vmatpush3.bf16.msra.mxu0 %v1433_v13 }
 0x7b2   : > { %2310 = vmatprep.subr.bf16.mxu0 %v2574_v25 }
 0x7b5   : > { %2311 = vmatpush3.bf16.msra.mxu0 %v1435_v17  ;;  %v1387_v17 = vunpack.c.l.bf16 %v2907_v36 }
 0x7b6   : > { %2312 = vmatprep.subr.bf16.mxu0 %v2574_v25 }
 0x7b8   : > { %2297 = vmatmul.mubr.msk.bf16.gmra.mrb[28].mxu0 %vm1104_vm3, %v1251_v45 }
 0x7b9   : > { %2316 = vmatprep.mubr.msk.bf16.mxu0 %vm2575_vm0, %v2574_v25  ;;  %2313 = vmatpush3.bf16.msra.mxu0 %v1437_v49 }
 0x7ba   : > { %2314 = vmatprep.subr.bf16.mxu0 %v2574_v25 }
 0x7bd   : > { %2315 = vmatpush3.bf16.msra.mxu0 %v1439_v53  ;;  %v1385_v53 = vunpack.c.l.bf16 %v2880_v22 }
 0x7be   : > { %2320 = vmatprep.subr.bf16.mxu0 %v2574_v25 }
 0x873   : > { %v2286_v51 = vpop.f32.mrb[16].mxu0 }
 0x874   : > { %v1395_v54 = vmul.f32 %v2286_v51, %v1379_v48  ;;  %v1314_v15 = vpop.f32.mrb[17].mxu0 }
 0x875   : > { %v1393_v31 = vmul.f32 %v1377_v47, %v1314_v15  ;;  %v2287_v24 = vpop.f32.mrb[18].mxu0  ;;  %v1386_v15 = vunpack.c.h.bf16 %v2880_v22  ;;  %v1390_v22 = vunpack.c.h.bf16 %v2968_v57 }
 0x876   : > { %v1396_v58 = vmul.f32 %v2287_v24, %v1380_v12  ;;  %v1317_v59 = vpop.f32.mrb[19].mxu0 }
 0x877   : > { %v1409_v1 = vadd.f32 %v1395_v54, %v1393_v31  ;;  %v1394_v4 = vmul.f32 %v1378_v52, %v1317_v59  ;;  %v1388_v52 = vunpack.c.h.bf16 %v2907_v36  ;;  %v1392_v36 = vunpack.c.h.bf16 %v3045_v21 }
 0x879   : > { %v1416_v29 = vadd.f32 %v1396_v58, %v1394_v4 }
 0x87b   : > { %v2290_v18 = vpop.f32.mrb[20].mxu0 }
 0x87c   : > { %v1330_v26 = vpop.f32.mrb[21].mxu0  ;;  %v1399_v45 = vmul.f32 %v2290_v18, %v1383_v60 }
 0x87d   : > { %v1397_v30 = vmul.f32 %v1381_v55, %v1330_v26  ;;  %v2291_v33 = vpop.f32.mrb[22].mxu0 }
 0x87e   : > { %v1333_v34 = vpop.f32.mrb[23].mxu0  ;;  %v1400_v46 = vmul.f32 %v2291_v33, %v1384_v2 }
 0x87f   : > { %v1410_v50 = vadd.f32 %v1409_v1, %v1397_v30  ;;  %v1398_v8 = vmul.f32 %v1382_v38, %v1333_v34  ;;  %v1391_v1 = vunpack.c.l.bf16 %v3045_v21 }
 0x881   : > { %v1417_v7 = vadd.f32 %v1416_v29, %v1398_v8  ;;  %v1411_v13 = vadd.f32 %v1410_v50, %v1399_v45  ;;  %v1389_v29 = vunpack.c.l.bf16 %v2968_v57 }
 0x883   : > { %v2294_v49 = vpop.f32.mrb[24].mxu0  ;;  %v1418_v47 = vadd.f32 %v1417_v7, %v1400_v46 }
 0x884   : > { %v1403_v48 = vmul.f32 %v2294_v49, %v1387_v17  ;;  %v1346_v51 = vpop.f32.mrb[25].mxu0 }
 0x885   : > { %v1401_v62 = vmul.f32 %v1385_v53, %v1346_v51  ;;  %v2295_v54 = vpop.f32.mrb[26].mxu0 }
 0x886   : > { %v1404_v12 = vmul.f32 %v2295_v54, %v1388_v52  ;;  %v1349_v10 = vpop.f32.mrb[27].mxu0 }
 0x887   : > { %v1412_v31 = vadd.f32 %v1411_v13, %v1401_v62  ;;  %v1402_v24 = vmul.f32 %v1386_v15, %v1349_v10 }
 0x889   : > { %v1419_v58 = vadd.f32 %v1418_v47, %v1402_v24  ;;  %v1413_v59 = vadd.f32 %v1412_v31, %v1403_v48 }
 0x88b   : > { %v2298_v4 = vpop.f32.mrb[28].mxu0  ;;  %v1420_v18 = vadd.f32 %v1419_v58, %v1404_v12 }
 0x88c   : > { %v1407_v55 = vmul.f32 %v2298_v4, %v1391_v1  ;;  %v1362_v26 = vpop.f32.mrb[29].mxu0 }
 0x88d   : > { %v1405_v60 = vmul.f32 %v1389_v29, %v1362_v26  ;;  %v2299_v30 = vpop.f32.mrb[30].mxu0 }
 0x88e   : > { %v1408_v33 = vmul.f32 %v2299_v30, %v1392_v36  ;;  %v1365_v38 = vpop.f32.mrb[31].mxu0 }
 0x88f   : > { %v1414_v34 = vadd.f32 %v1413_v59, %v1405_v60  ;;  %v1406_v45 = vmul.f32 %v1390_v22, %v1365_v38  ;;  %v1952_v22 = vld [vmem:[%s3339_s4] ss:$0 sm:$0xff] }
 0x891   : > { %v3189_v50 = vadd.f32 %v1414_v34, %v1407_v55  ;;  %v1421_v2 = vadd.f32 %v1420_v18, %v1406_v45 }
 0x893   : > { %v3191_v8 = vadd.f32 %v1421_v2, %v1408_v33 }
 0x895   : > { %v1423_v46 = vpack.c.bf16 %v3191_v8, %v3189_v50 }
 0x897   : > { %2317 = vmatmul.mubr.bf16.vlgmr.msra.gmra.mrb[32].mxu0 %v1423_v46 }
 0x898   : > { %2321 = vmatpush3.bf16.msra.mxu0 %v3051_v35  ;;  %2322 = vmatprep.mubr.msk.bf16.mxu0 %vm2575_vm0, %v2574_v25  ;;  %vm1631_vm0 = vcmask 23560  }
 0x96a   : > { %v1482_v21 = vpop.f32.mrb[32].mxu0 }
 0x96b   : > { %v2318_v57 = vpop.f32.mrb[33].mxu0  ;;  %v1489_v7 = vsel %vm1104_vm3, %v1482_v21, -inf }
 0x96c   : > { %1490 = vmax.xlane.f32.xlu0 %v1489_v7  ;;  %v1485_v13 = vpop.f32.mrb[34].mxu0 }
 0x96d   : > { %v2319_v17 = vpop.f32.mrb[35].mxu0  ;;  %v1492_v49 = vsel %vm1104_vm3, %v1485_v13, -inf }
 0x96e   : > { %1493 = vmax.xlane.f32.xlu1 %v1492_v49 }
 0x97f   : > { %1566 = vrot.lane.b32.xlu1 %v2903_v23, %s2577_s12 }
 0x983   : > { %1570 = vrot.lane.b32.xlu1 %v2921_v39, %s2577_s12 }
 0x987   : > { %1572 = vrot.lane.b32.xlu1 %v2928_v40, %s2577_s12 }
 0x98b   : > { %1576 = vrot.lane.b32.xlu1 %v2942_v42, %s2577_s12 }
 0x98f   : > { %1580 = vrot.lane.b32.xlu1 %v2956_v44, %s2577_s12 }
 0x9f9   : > { %v1491_v53 = vpop.xlane.xlu0 %1490 }
 0x9fa   : > { %v1495_v47 = vsub.f32 %v1482_v21, %v1491_v53 }
 0x9fb   : > { %v1494_v48 = vpop.xlane.xlu1 %1493 }
 0x9fc   : > { %v1497_v51 = vmul.f32 1.442695, %v1495_v47  ;;  %v1496_v52 = vsub.f32 %v1485_v13, %v1494_v48 }
 0x9fe   : > { %2486 = vpow2.f32 %v1497_v51  ;;  %v1499_v35 = vmul.f32 1.442695, %v1496_v52 }
 0x9ff   : > { %v1567_v24 = vpop.permute.xlu1 %1566 }
 0xa00   : > { %2488 = vpow2.f32 %v1499_v35  ;;  %2327 = vmatpush3.bf16.msra.mxu1 %v1567_v24 }
 0xa01   : > { %2328 = vmatprep.subr.bf16.mxu1 %v2574_v25 }
 0xa08   : > { %v2487_v62 = vpop.eup %2486 }
 0xa09   : > { %v1501_v54 = vsel %vm1104_vm3, %v2487_v62, 0.0 }
 0xa0a   : > { %v2489_v15 = vpop.eup %2488  ;;  %1502 = vadd.xlane.f32.xlu0 %v1501_v54 }
 0xa0b   : > { %v1504_v12 = vsel %vm1104_vm3, %v2489_v15, 0.0 }
 0xa0e   : > { %1505 = vadd.xlane.f32.xlu0 %v1504_v12 }
 0xa24   : > { %1568 = vrot.lane.b32.xlu0 %v2912_v37, %s2577_s12  ;;  %v1571_v37 = vpop.permute.xlu1 %1570 }
 0xa28   : > { %1574 = vrot.lane.b32.xlu0 %v2935_v41, %s2577_s12 }
 0xa2c   : > { %1578 = vrot.lane.b32.xlu0 %v2949_v43, %s2577_s12  ;;  %v1573_v43 = vpop.permute.xlu1 %1572  ;;  %s2588_s12 = smov 36  }
 0xa30   : > { %v1577_v59 = vpop.permute.xlu1 %1576 }
 0xa34   : > { %v1581_v4 = vpop.permute.xlu1 %1580 }
 0xa97   : > { %v1503_v10 = vpop.xlane.xlu0 %1502 }
 0xa98   : > { %2490 = vrcp.f32 %v1503_v10 }
 0xa9b   : > { %v1506_v31 = vpop.xlane.xlu0 %1505 }
 0xa9c   : > { %2492 = vrcp.f32 %v1506_v31 }
 0xa9f   : > { %v1569_v23 = vpop.permute.xlu0 %1568 }
 0xaa0   : > { %2329 = vmatpush3.bf16.msra.mxu1 %v1569_v23 }
 0xaa1   : > { %2330 = vmatprep.subr.bf16.mxu1 %v2574_v25 }
 0xaa2   : > { %v2491_v39 = vpop.eup %2490 }
 0xaa3   : > { %v3212_v41 = vmul.f32 %v2491_v39, %v2487_v62  ;;  %v1575_v58 = vpop.permute.xlu0 %1574 }
 0xaa4   : > { %2331 = vmatpush3.bf16.msra.mxu1 %v1571_v37 }
 0xaa5   : > { %2332 = vmatprep.subr.bf16.mxu1 %v2574_v25 }
 0xaa6   : > { %v2493_v40 = vpop.eup %2492 }
 0xaa7   : > { %v3214_v42 = vmul.f32 %v2493_v40, %v2489_v15  ;;  %v1579_v1 = vpop.permute.xlu0 %1578 }
 0xaa8   : > { %2333 = vmatpush3.bf16.msra.mxu1 %v1573_v43 }
 0xaa9   : > { %v1511_v44 = vpack.c.bf16 %v3214_v42, %v3212_v41  ;;  %2334 = vmatprep.subr.bf16.mxu1 %v2574_v25 }
 0xaab   : > { %2323 = vmatmul.mubr.msk.bf16.vlgmr.msra.gmra.mrb[36].mxu0 %vm1104_vm3, %v1511_v44  ;;  %vm1663_vm3 = vcmask 7168  }
 0xaac   : > { %2335 = vmatpush3.bf16.msra.mxu1 %v1575_v58 }
 0xaad   : > { %2336 = vmatprep.subr.bf16.mxu1 %v2574_v25 }
 0xab0   : > { %2337 = vmatpush3.bf16.msra.mxu1 %v1577_v59 }
 0xab1   : > { %2338 = vmatprep.subr.bf16.mxu1 %v2574_v25 }
 0xab4   : > { %2339 = vmatpush3.bf16.msra.mxu1 %v1579_v1 }
 0xab5   : > { %2340 = vmatprep.subr.bf16.mxu1 %v2574_v25 }
 0xab8   : > { %2341 = vmatpush3.bf16.msra.mxu1 %v1581_v4 }
 0xb7e   : > { %v1549_v29 = vpop.f32.mrb[36].mxu0 }
 0xb7f   : > { %v2324_v18 = vpop.f32.mrb[37].mxu0  ;;  %v1556_v26 = vmul.f32 %v1549_v29, %v3189_v50 }
 0xb80   : > { %v1552_v55 = vpop.f32.mrb[38].mxu0 }
 0xb81   : > { %v1557_v36 = vmul.f32 %v1552_v55, %v3191_v8  ;;  %v2325_v60 = vpop.f32.mrb[39].mxu0 }
 0xb83   : > { %v1558_v30 = vpack.c.bf16 %v1557_v36, %v1556_v26 }
 0xb85   : > { %2343 = vmatmul.mubr.bf16.vlgmr.msra.gmra.mrb[28].mxu1 %v1558_v30 }
 0xc58   : > { %v1624_v33 = vpop.f32.mrb[28].mxu1 }
 0xc59   : > { %v1625_v25 = vadd.f32 %v1952_v22, %v1624_v33  ;;  %v2344_v38 = vpop.f32.mrb[29].mxu1 }
 0xc5a   : > { %v1627_v34 = vpop.f32.mrb[30].mxu1 }
 0xc5b   : > { %v1628_v45 = vadd.f32 %v1952_v22, %v1627_v34  ;;  %v2345_v2 = vpop.f32.mrb[31].mxu1  ;;  %v1632_v46 = vsel %vm1631_vm0, %v1625_v25, -inf  ;;  %1664 = vst.msk [vmem:[%s3230_s17] sm:$0xff] %vm1663_vm3, %v1625_v25  ;;  %v1953_v48 = vmul.f32 -1.442695, %v1625_v25 }
 0xc5c   : > { %1633 = vmax.xlane.f32.xlu0 %v1632_v46 }
 0xc5d   : > { %v1635_v50 = vsel %vm1631_vm0, %v1628_v45, -inf  ;;  %1665 = vst.msk [vmem:[%s3230_s17 + $0x8] sm:$0xff] %vm1663_vm3, %v1628_v45  ;;  %v1954_v47 = vmul.f32 -1.442695, %v1628_v45 }
 0xc5e   : > { %1636 = vmax.xlane.f32.xlu1 %v1635_v50 }
 0xce9   : > { %v1634_v8 = vpop.xlane.xlu0 %1633 }
 0xcea   : > { %v1638_v21 = vsub.f32 %v1625_v25, %v1634_v8 }
 0xceb   : > { %v1637_v57 = vpop.xlane.xlu1 %1636 }
 0xcec   : > { %v1640_v7 = vmul.f32 1.442695, %v1638_v21  ;;  %v1639_v13 = vsub.f32 %v1628_v45, %v1637_v57 }
 0xcee   : > { %2494 = vpow2.f32 %v1640_v7  ;;  %v1642_v17 = vmul.f32 1.442695, %v1639_v13 }
 0xcf0   : > { %2496 = vpow2.f32 %v1642_v17 }
 0xcf1   : > { %2498 = vpow2.f32 %v1954_v47 }
 0xcf2   : > { %2500 = vpow2.f32 %v1953_v48 }
 0xcf8   : > { %v2495_v49 = vpop.eup %2494 }
 0xcf9   : > { %1646 = vrot.lane.b32.xlu0 %v2495_v49, %s2578_s23 }
 0xcfa   : > { %v2497_v53 = vpop.eup %2496 }
 0xcfb   : > { %1648 = vrot.lane.b32.xlu1 %v2497_v53, %s2578_s23  ;;  %v2499_v62 = vpop.eup %2498 }
 0xcfc   : > { %v2501_v15 = vpop.eup %2500  ;;  %v1673_v12 = vadd.f32 1.0, %v2499_v62 }
 0xcfd   : > { %v1672_v10 = vadd.f32 1.0, %v2501_v15 }
 0xcfe   : > { %2502 = vrcp.f32 %v1673_v12 }
 0xcff   : > { %2504 = vrcp.f32 %v1672_v10 }
 0xd08   : > { %v2503_v31 = vpop.eup %2502 }
 0xd09   : > { %v2505_v24 = vpop.eup %2504 }
 0xd6b   : > { %v1647_v51 = vpop.permute.xlu0 %1646 }
 0xd6c   : > { %v1653_v52 = vsel %vm1652_vm8, %v1647_v51, 0.0 }
 0xd6d   : > { %1654 = vadd.xlane.f32.xlu0 %v1653_v52  ;;  %v1649_v35 = vpop.permute.xlu1 %1648 }
 0xd6e   : > { %v1656_v54 = vsel %vm1652_vm8, %v1649_v35, 0.0 }
 0xd6f   : > { %1657 = vadd.xlane.f32.xlu1 %v1656_v54 }
 0xd80   : > { %1682 = vrot.lane.b32.xlu1 %v2503_v31, %s2579_s25 }
 0xd83   : > { %1680 = vrot.lane.b32.xlu0 %v2505_v24, %s2579_s25 }
 0xd84   : > { %1704 = vrot.lane.b32.xlu1 %v3214_v42, %s2580_s26 }
 0xd87   : > { %1702 = vrot.lane.b32.xlu0 %v3212_v41, %s2580_s26  ;;  %s2510_s26 = scalar_lea.vmem %s3289_s15, 256 }
 0xd88   : > { %1715 = vrot.lane.b32.xlu1 %v3123_v0, %s2581_s28  ;;  %p2511_p13 = scmp.ne.s32.totalorder %s3289_s15, %s2510_s26 }
 0xd8a   : > { %p2512_p0 = pnand %p2511_p13, %p2663_p6 }
 0xd8b   : > { %1713 = vrot.lane.b32.xlu0 %v3107_v5, %s2581_s28 }
 0xd8c   : > { %1726 = vrot.lane.b32.xlu1 %v3125_v32, %s2582_s6  ;;  %p2513_p1 = pneg %p2512_p0 }
 0xd8f   : > { %1724 = vrot.lane.b32.xlu0 %v3109_v9, %s2582_s6  ;;  %s2589_s6 = smov [#allocation5]  }
 0xd90   : > { %1737 = vrot.lane.b32.xlu1 %v3127_v56, %s2583_s7 }
 0xd93   : > { %1735 = vrot.lane.b32.xlu0 %v3111_v14, %s2583_s7  ;;  %s2514_s7 = sshll.u32 %s2589_s6, 4  ;;  %s2515_s7 = int_to_ptr.vmem [resolvable:$false] %s2514_s7 }
 0xd94   : > { %1748 = vrot.lane.b32.xlu1 %v3129_v63, %s2584_s9  ;;  %p2517_p2 = scmp.lt.s32.totalorder %s3289_s15, %s2515_s7 }
 0xd97   : > { %1746 = vrot.lane.b32.xlu0 %v3113_v16, %s2584_s9  ;;  %s2516_s9 = scalar_lea.vmem %s2515_s7, 512 }
 0xd98   : > { %1759 = vrot.lane.b32.xlu1 %v3131_v61, %s2585_s10  ;;  %p2518_p3 = scmp.lt.s32.totalorder %s2516_s9, %s2510_s26 }
 0xd9a   : > { %p2519_p4 = por %p2518_p3, %p2517_p2 }
 0xd9b   : > { %1757 = vrot.lane.b32.xlu0 %v3115_v19, %s2585_s10 }
 0xd9c   : > { %p2520_p5 = pnand %p2519_p4, %p2513_p1 }
 0xdfa   : > { %v1655_v5 = vpop.xlane.xlu0 %1654 }
 0xdfb   : > { %2506 = vrcp.f32 %v1655_v5 }
 0xdfc   : > { %v1658_v9 = vpop.xlane.xlu1 %1657 }
 0xdfd   : > { %2508 = vrcp.f32 %v1658_v9 }
 0xdfe   : > { %v1681_v0 = vpop.permute.xlu0 %1680 }
 0xdff   : > { %1687 = vst.msk [vmem:[%s3230_s17] sm:$0xff] %vm1686_vm9, %v1681_v0 }
 0xe00   : > { %v1683_v32 = vpop.permute.xlu1 %1682 }
 0xe01   : > { %1688 = vst.msk [vmem:[%s3230_s17 + $0x8] sm:$0xff] %vm1686_vm9, %v1683_v32 }
 0xe02   : > { %v1703_v19 = vpop.permute.xlu0 %1702 }
 0xe04   : > { %v1705_v63 = vpop.permute.xlu1 %1704 }
 0xe05   : > { %v2507_v14 = vpop.eup %2506 }
 0xe06   : > { %v1660_v56 = vmul.f32 %v2507_v14, %v2495_v49  ;;  %v1714_v61 = vpop.permute.xlu0 %1713 }
 0xe07   : > { %v2509_v23 = vpop.eup %2508 }
 0xe08   : > { %1691 = vrot.lane.b32.xlu0 %v1660_v56, %s2579_s25  ;;  %v1662_v16 = vmul.f32 %v2509_v23, %v2497_v53  ;;  %v1716_v37 = vpop.permute.xlu1 %1715 }
 0xe0a   : > { %1693 = vrot.lane.b32.xlu1 %v1662_v16, %s2579_s25  ;;  %v1725_v39 = vpop.permute.xlu0 %1724  ;;  %s3286_s25 = scalar_lea.hbm %s3340_s5, %s1962_s13 }
 0xe0c   : > { %1768 = vrot.lane.b32.xlu0 %v3117_v20, %s2586_s11  ;;  %v1727_v20 = vpop.permute.xlu1 %1726 }
 0xe0e   : > { %1770 = vrot.lane.b32.xlu1 %v3133_v3, %s2586_s11  ;;  %v1736_v3 = vpop.permute.xlu0 %1735 }
 0xe10   : > { %1779 = vrot.lane.b32.xlu0 %v3119_v27, %s2587_s14  ;;  %v1738_v40 = vpop.permute.xlu1 %1737 }
 0xe12   : > { %1781 = vrot.lane.b32.xlu1 %v3135_v6, %s2587_s14  ;;  %v1747_v27 = vpop.permute.xlu0 %1746 }
 0xe14   : > { %1790 = vrot.lane.b32.xlu0 %v3121_v28, %s2588_s12  ;;  %v1749_v6 = vpop.permute.xlu1 %1748 }
 0xe16   : > { %1792 = vrot.lane.b32.xlu1 %v3137_v11, %s2588_s12  ;;  %v1758_v41 = vpop.permute.xlu0 %1757 }
 0xe18   : > { %v1760_v28 = vpop.permute.xlu1 %1759 }
 0xe7a   : > { %v1692_v11 = vpop.permute.xlu0 %1691 }
 0xe7b   : > { %1698 = vst.msk [vmem:[%s3230_s17] sm:$0xff] %vm1697_vm10, %v1692_v11 }
 0xe7c   : > { %1709 = vst.msk [vmem:[%s3230_s17] sm:$0xff] %vm1708_vm11, %v1703_v19  ;;  %v1694_v42 = vpop.permute.xlu1 %1693 }
 0xe7d   : > { %1720 = vst.msk [vmem:[%s3230_s17] sm:$0xff] %vm1719_vm12, %v1714_v61 }
 0xe7e   : > { %1699 = vst.msk [vmem:[%s3230_s17 + $0x8] sm:$0xff] %vm1697_vm10, %v1694_v42  ;;  %v1769_v43 = vpop.permute.xlu0 %1768 }
 0xe7f   : > { %1731 = vst.msk [vmem:[%s3230_s17] sm:$0xff] %vm1730_vm13, %v1725_v39 }
 0xe80   : > { %1710 = vst.msk [vmem:[%s3230_s17 + $0x8] sm:$0xff] %vm1708_vm11, %v1705_v63  ;;  %v1771_v44 = vpop.permute.xlu1 %1770 }
 0xe81   : > { %1721 = vst.msk [vmem:[%s3230_s17 + $0x8] sm:$0xff] %vm1719_vm12, %v1716_v37 }
 0xe82   : > { %1742 = vst.msk [vmem:[%s3230_s17] sm:$0xff] %vm1741_vm14, %v1736_v3  ;;  %v1780_v58 = vpop.permute.xlu0 %1779 }
 0xe83   : > { %1732 = vst.msk [vmem:[%s3230_s17 + $0x8] sm:$0xff] %vm1730_vm13, %v1727_v20 }
 0xe84   : > { %1753 = vst.msk [vmem:[%s3230_s17] sm:$0xff] %vm1752_vm15, %v1747_v27  ;;  %v1782_v59 = vpop.permute.xlu1 %1781 }
 0xe85   : > { %1764 = vst.msk [vmem:[%s3230_s17] sm:$0xff] %vm1763_vm1, %v1758_v41 }
 0xe86   : > { %1743 = vst.msk [vmem:[%s3230_s17 + $0x8] sm:$0xff] %vm1741_vm14, %v1738_v40  ;;  %v1791_v1 = vpop.permute.xlu0 %1790 }
 0xe87   : > { %1775 = vst.msk [vmem:[%s3230_s17] sm:$0xff] %vm1774_vm2, %v1769_v43 }
 0xe88   : > { %1754 = vst.msk [vmem:[%s3230_s17 + $0x8] sm:$0xff] %vm1752_vm15, %v1749_v6  ;;  %v1793_v4 = vpop.permute.xlu1 %1792 }
 0xe89   : > { %1765 = vst.msk [vmem:[%s3230_s17 + $0x8] sm:$0xff] %vm1763_vm1, %v1760_v28 }
 0xe8a   : > { %1786 = vst.msk [vmem:[%s3230_s17] sm:$0xff] %vm1785_vm4, %v1780_v58 }
 0xe8b   : > { %1776 = vst.msk [vmem:[%s3230_s17 + $0x8] sm:$0xff] %vm1774_vm2, %v1771_v44 }
 0xe8c   : > { %1787 = vst.msk [vmem:[%s3230_s17 + $0x8] sm:$0xff] %vm1785_vm4, %v1782_v59 }
 0xe8d   : > { %1797 = vst.msk [vmem:[%s3230_s17] sm:$0xff] %vm1796_vm5, %v1791_v1  ;;  %1798 = vst.msk [vmem:[%s3230_s17 + $0x8] sm:$0xff] %vm1796_vm5, %v1793_v4 }
 0xe8e   : > { %2523 = shalt.err (!%p2520_p5)
}
 0xe8f   : > { %s2524_s17 = scalar_lea.hbm %s3286_s25, 256  ;;  %s2528_s14 = scalar_lea.hbm %s3340_s5, 512 }
 0xe90   : > { %p2525_p7 = scmp.ne.s32.totalorder %s3286_s25, %s2524_s17  ;;  %p2529_p12 = scmp.lt.u32.totalorder %s3286_s25, %s3340_s5 }
 0xe91   : > { %p2530_p13 = scmp.lt.u32.totalorder %s2528_s14, %s2524_s17  ;;  %p2532_p1 = scmp.lt.u32.totalorder %s2524_s17, %s3286_s25 }
 0xe92   : > { %p2526_p10 = pnand %p2525_p7, %p2663_p6 }
 0xe93   : > { %p2531_p0 = por %p2530_p13, %p2529_p12 }
 0xe94   : > { %p2527_p11 = pneg %p2526_p10 }
 0xe95   : > { %p2533_p2 = por %p2532_p1, %p2531_p0 }
 0xe97   : > { %p2534_p3 = pnand %p2533_p2, %p2527_p11 }
 0xe99   : > { %2537 = shalt.err (!%p2534_p3)
}
 0xe9a   : > { %s2590_s16 = smov 128  }
 0xe9b   : > { %2347 = dma.vmem_to_hbm [thread:$0]  (%p2663_p6), %s3289_s15, 256, %s3286_s25, %s1800_s22, %s2590_s16, %s2590_s16, %s2581_s28  }
 0xe9c PF: > { %s1828_s23 = sand.u32 1, %s2560_s18   ;;  %p2350_p4 = pnand %p1901_p9, %p2667_p8 }
 0xe9d   : > { %s1829_s26 = scalar_lea.sflag [#allocation6], %s1828_s23 }
 0xe9e   : > { %2555 = dma.done.wait (!%p2350_p4), %s1829_s26, 256  }
 0xe9f   : > { %2557 = vsyncadd (!%p2350_p4), %s1829_s26, 4294967040  ;;  %p15_p5 = scmp.ge.s32.totalorder %s2644_s24, 4   ;;  %s3344_s18 = smov %s2564_s19 }
 0xea0   : > { %s3345_s19 = smov %s2568_s20  ;;  %s3346_s20 = smov %s2657_s27 }
 0xea1   : > { %s3347_s21 = smov %s2644_s24  ;;  %17 = sbr.rel (!%p15_p5) target bundleno = 3 (0x3), region = 181 }
 0xea8   :  { %1834 = vsyncpa [#allocation6], 1 }
 0xea9   :  { %1836 = vsyncpa [#allocation6 + $0x1], 1 }

</bundles_post_ra>
